<compile_context>
chip_gen: v7x
topology: tpu7x:2x2x1
jax: 0.10.0
libtpu: 0.0.40
codegen_flags: <defaults>
</compile_context>

<pallas_src>
import jax
import jax.numpy as jnp
import numpy as np
from jax.experimental import pallas as pl
from jax.experimental.pallas import tpu as pltpu

# ----------------------------- configuration -------------------------------
B, T, D_IN, D_HID = 4, 8, 8, 32          # batch, history length, input feats, LSTM hidden
N_LAYERS = 2                             # encoder == decoder layers (hard-wired below)
M, Q = 2, 4                              # output vars, quantiles  -> d_output = M*Q
D_FF = 6                                 # known-future features per step
HORIZON = 5                              # horizon_span == horizon_max
D_OUT = M * Q
D_DEC_IN = D_FF + M                      # decoder LSTM layer-0 input size

F32 = jnp.float32


# ------------------------------- kernel ------------------------------------
def _apply_gates(gates, c):
    """LSTM gate nonlinearities on the full [B, 4H] slab (PyTorch gate order i,f,g,o)."""
    s = jax.nn.sigmoid(gates)                       # one full-width sigmoid
    t = jnp.tanh(gates)                             # one full-width tanh
    i = s[:, 0 * D_HID:1 * D_HID]
    f = s[:, 1 * D_HID:2 * D_HID]
    g = t[:, 2 * D_HID:3 * D_HID]
    o = s[:, 3 * D_HID:4 * D_HID]
    c_new = f * c + i * g
    h_new = o * jnp.tanh(c_new)
    return h_new, c_new


def encdec_kernel(x_ref, ff_ref,
                  e0_wih_ref, e0_whh_ref, e0_b_ref,
                  e1_cat_ref, e1_b_ref,
                  d0_wy_ref, d0_wf_ref, d0_whh_ref, d0_b_ref,
                  d1_cat_ref, d1_b_ref,
                  ow_ref, ob_ref, ow_fold_ref, ob_fold_ref,
                  out_ref):
    # Hoist all loads out of the (unrolled) time loops.
    x2d = x_ref[...]                                   # [T*B, D_IN]   (time-major rows)
    ff2d = ff_ref[...]                                 # [HORIZON*B, D_FF]
    e0_wih, e0_whh, e0_b = e0_wih_ref[...], e0_whh_ref[...], e0_b_ref[...]
    e1_cat, e1_b = e1_cat_ref[...], e1_b_ref[...]
    d0_wy, d0_wf = d0_wy_ref[...], d0_wf_ref[...]
    d0_whh, d0_b = d0_whh_ref[...], d0_b_ref[...]
    d1_cat, d1_b = d1_cat_ref[...], d1_b_ref[...]
    ow, ob = ow_ref[...], ob_ref[...]
    ow_fold, ob_fold = ow_fold_ref[...], ob_fold_ref[...]

    # ---- hoisted input->hidden gate contributions (one big matmul each) ----
    in_gates_all = jnp.dot(x2d, e0_wih, preferred_element_type=F32) + e0_b     # [T*B, 4H]
    ff_gates_all = jnp.dot(ff2d, d0_wf, preferred_element_type=F32) + d0_b     # [HORIZON*B, 4H]

    zeros = jnp.zeros((B, D_HID), F32)
    h0 = c0 = h1 = c1 = zeros

    # ---------------- encoder: 2-layer LSTM over the history (unrolled) -----
    for t in range(T):
        g0 = in_gates_all[t * B:(t + 1) * B, :] + jnp.dot(
            h0, e0_whh, preferred_element_type=F32)
        h0, c0 = _apply_gates(g0, c0)
        g1 = jnp.dot(jnp.concatenate([h0, h1], axis=1), e1_cat,
                     preferred_element_type=F32) + e1_b
        h1, c1 = _apply_gates(g1, c1)

    # first decoder input:  y_in0 = X[:, -1, :M]  -> its layer-0 gate contribution
    y_gate = jnp.dot(x2d[(T - 1) * B:T * B, :M], d0_wy, preferred_element_type=F32)

    # -------------- decoder: autoregressive 2-layer LSTM (unrolled) ---------
    dh0, dc0, dh1, dc1 = h0, c0, h1, c1
    for t in range(HORIZON):
        g0 = (ff_gates_all[t * B:(t + 1) * B, :] + y_gate
              + jnp.dot(dh0, d0_whh, preferred_element_type=F32))
        dh0, dc0 = _apply_gates(g0, dc0)
        g1 = jnp.dot(jnp.concatenate([dh0, dh1], axis=1), d1_cat,
                     preferred_element_type=F32) + d1_b
        dh1, dc1 = _apply_gates(g1, dc1)

        # full output projection (off the serial chain), static-indexed store
        out_ref[t] = jnp.dot(dh1, ow, preferred_element_type=F32) + ob

        # folded feedback: (y[:, :M]) @ W_y  ==  dh1 @ ow_fold + ob_fold
        if t + 1 < HORIZON:
            y_gate = jnp.dot(dh1, ow_fold, preferred_element_type=F32) + ob_fold


# ------------------------------- wrapper ------------------------------------
@jax.jit
def recurrent_encoder_decoder(X, future_features, params):
    """X: [B, T, D_IN] f32, future_features: [B, HORIZON, D_FF] f32.
    Returns [B, HORIZON, M, Q] f32 (PyTorch forward with teacher_forcing=False)."""
    (e0_wih, e0_whh, e0_b, e1_wih, e1_whh, e1_b,
     d0_wy, d0_wf, d0_whh, d0_b, d1_wih, d1_whh, d1_b, ow, ob) = params

    # time-major, flattened to [steps*B, feat] so the hoisted matmuls are 2-D
    x2d = jnp.transpose(X, (1, 0, 2)).reshape(T * B, D_IN)
    ff2d = jnp.transpose(future_features, (1, 0, 2)).reshape(HORIZON * B, D_FF)

    # ---- one-time parameter folding (setup, not on the hot path) ----
    e1_cat = jnp.concatenate([e1_wih, e1_whh], axis=0)        # [2H, 4H]
    d1_cat = jnp.concatenate([d1_wih, d1_whh], axis=0)        # [2H, 4H]
    ow_fold = ow[:, :M] @ d0_wy                               # [H, 4H]
    ob_fold = ob[:, :M] @ d0_wy                               # [1, 4H]

    inputs = [x2d, ff2d,
              e0_wih, e0_whh, e0_b, e1_cat, e1_b,
              d0_wy, d0_wf, d0_whh, d0_b, d1_cat, d1_b,
              ow, ob, ow_fold, ob_fold]
    vmem = pl.BlockSpec(memory_space=pltpu.MemorySpace.VMEM)

    out_tm = pl.pallas_call(
        encdec_kernel,
        out_shape=jax.ShapeDtypeStruct((HORIZON, B, D_OUT), F32),
        in_specs=[vmem] * len(inputs),
        out_specs=vmem,
    )(*inputs)

    out = jnp.transpose(out_tm, (1, 0, 2))                    # [B, HORIZON, M*Q]
    return out.reshape(B, HORIZON, M, Q)


# ----------------------- deterministic parameter init -----------------------
def make_params(key):
    k = 1.0 / np.sqrt(D_HID)

    def u(key, shape):
        return jax.random.uniform(key, shape, F32, -k, k)

    keys = jax.random.split(key, 24)
    ki = iter(keys)

    # encoder LSTM (PyTorch shapes, stored transposed for x @ W^T)
    e0_wih = u(next(ki), (4 * D_HID, D_IN)).T            # [D_IN, 4H]
    e0_whh = u(next(ki), (4 * D_HID, D_HID)).T           # [H, 4H]
    e0_b = (u(next(ki), (4 * D_HID,)) + u(next(ki), (4 * D_HID,)))[None, :]
    e1_wih = u(next(ki), (4 * D_HID, D_HID)).T
    e1_whh = u(next(ki), (4 * D_HID, D_HID)).T
    e1_b = (u(next(ki), (4 * D_HID,)) + u(next(ki), (4 * D_HID,)))[None, :]

    # decoder LSTM; layer-0 input is concat([y (M), future_feats (D_FF)])
    d0_wih_t = u(next(ki), (4 * D_HID, D_DEC_IN)).T      # [M+D_FF, 4H]
    d0_wy = d0_wih_t[:M, :]                              # [M, 4H]
    d0_wf = d0_wih_t[M:, :]                              # [D_FF, 4H]
    d0_whh = u(next(ki), (4 * D_HID, D_HID)).T
    d0_b = (u(next(ki), (4 * D_HID,)) + u(next(ki), (4 * D_HID,)))[None, :]
    d1_wih = u(next(ki), (4 * D_HID, D_HID)).T
    d1_whh = u(next(ki), (4 * D_HID, D_HID)).T
    d1_b = (u(next(ki), (4 * D_HID,)) + u(next(ki), (4 * D_HID,)))[None, :]

    # output projection nn.Linear(d_hidden, M*Q)
    ow = u(next(ki), (D_OUT, D_HID)).T                   # [H, M*Q]
    ob = u(next(ki), (D_OUT,))[None, :]                  # [1, M*Q]

    return (e0_wih, e0_whh, e0_b, e1_wih, e1_whh, e1_b,
            d0_wy, d0_wf, d0_whh, d0_b, d1_wih, d1_whh, d1_b,
            ow, ob)


# --------------------------- pure-JAX reference -----------------------------
def reference(X, ff, params):
    (e0_wih, e0_whh, e0_b, e1_wih, e1_whh, e1_b,
     d0_wy, d0_wf, d0_whh, d0_b, d1_wih, d1_whh, d1_b, ow, ob) = params

    def cell(x, h, c, wih, whh, b):
        g = x @ wih + h @ whh + b
        i = jax.nn.sigmoid(g[:, :D_HID])
        f = jax.nn.sigmoid(g[:, D_HID:2 * D_HID])
        gg = jnp.tanh(g[:, 2 * D_HID:3 * D_HID])
        o = jax.nn.sigmoid(g[:, 3 * D_HID:])
        c = f * c + i * gg
        return o * jnp.tanh(c), c

    h0 = c0 = h1 = c1 = jnp.zeros((B, D_HID), F32)
    for t in range(T):
        h0, c0 = cell(X[:, t, :], h0, c0, e0_wih, e0_whh, e0_b)
        h1, c1 = cell(h0, h1, c1, e1_wih, e1_whh, e1_b)

    y_in = X[:, -1, :M]
    outs = []
    for t in range(HORIZON):
        in_t = jnp.concatenate([y_in, ff[:, t, :]], axis=1)
        h0, c0 = cell(in_t, h0, c0, jnp.concatenate([d0_wy, d0_wf], axis=0), d0_whh, d0_b)
        h1, c1 = cell(h0, h1, c1, d1_wih, d1_whh, d1_b)
        y = h1 @ ow + ob
        outs.append(y)
        y_in = y[:, :M]
    out = jnp.stack(outs, axis=1)                        # [B, HORIZON, M*Q]
    return out.reshape(B, HORIZON, M, Q)


# --------------------------------- main --------------------------------------
if __name__ == "__main__":
    # TODO(synk): teacher forcing (torch.rand driven) and inter-layer dropout are
    # inactive in eval / teacher_forcing=False mode and are not implemented.
    root = jax.random.PRNGKey(0)
    kx, kf, kp = jax.random.split(root, 3)

    X = jax.random.normal(kx, (B, T, D_IN), F32)
    future_features = jax.random.normal(kf, (B, HORIZON, D_FF), F32)
    params = make_params(kp)

    out = recurrent_encoder_decoder(X, future_features, params)
    out = jax.block_until_ready(out)
    assert out.shape == (B, HORIZON, M, Q), out.shape

    ref = jax.block_until_ready(reference(X, future_features, params))
    np.testing.assert_allclose(np.asarray(out), np.asarray(ref), rtol=1e-3, atol=1e-3)

    print("KERNEL_OK")
</pallas_src>

<mosaic_0001>
module attributes {stable_mosaic.version = 11 : i64} {
  func.func @encdec_kernel(%arg0: memref<32x8xf32, #tpu.memory_space<vmem>>, %arg1: memref<20x6xf32, #tpu.memory_space<vmem>>, %arg2: memref<8x128xf32, #tpu.memory_space<vmem>>, %arg3: memref<32x128xf32, #tpu.memory_space<vmem>>, %arg4: memref<1x128xf32, #tpu.memory_space<vmem>>, %arg5: memref<64x128xf32, #tpu.memory_space<vmem>>, %arg6: memref<1x128xf32, #tpu.memory_space<vmem>>, %arg7: memref<2x128xf32, #tpu.memory_space<vmem>>, %arg8: memref<6x128xf32, #tpu.memory_space<vmem>>, %arg9: memref<32x128xf32, #tpu.memory_space<vmem>>, %arg10: memref<1x128xf32, #tpu.memory_space<vmem>>, %arg11: memref<64x128xf32, #tpu.memory_space<vmem>>, %arg12: memref<1x128xf32, #tpu.memory_space<vmem>>, %arg13: memref<32x8xf32, #tpu.memory_space<vmem>>, %arg14: memref<1x8xf32, #tpu.memory_space<vmem>>, %arg15: memref<32x128xf32, #tpu.memory_space<vmem>>, %arg16: memref<1x128xf32, #tpu.memory_space<vmem>>, %arg17: memref<5x4x8xf32, #tpu.memory_space<vmem>>) attributes {dimension_semantics = [], scalar_prefetch = 0 : i64, scratch_operands = 0 : i64, tpu.core_type = #tpu.core_type<tc>} {
    %c0 = arith.constant 0 : index
    %c0_0 = arith.constant 0 : index
    %0 = vector.load %arg0[%c0, %c0_0] : memref<32x8xf32, #tpu.memory_space<vmem>>, vector<32x8xf32>
    %c0_1 = arith.constant 0 : index
    %c0_2 = arith.constant 0 : index
    %1 = vector.load %arg1[%c0_1, %c0_2] : memref<20x6xf32, #tpu.memory_space<vmem>>, vector<20x6xf32>
    %c0_3 = arith.constant 0 : index
    %c0_4 = arith.constant 0 : index
    %2 = vector.load %arg2[%c0_3, %c0_4] : memref<8x128xf32, #tpu.memory_space<vmem>>, vector<8x128xf32>
    %c0_5 = arith.constant 0 : index
    %c0_6 = arith.constant 0 : index
    %3 = vector.load %arg3[%c0_5, %c0_6] : memref<32x128xf32, #tpu.memory_space<vmem>>, vector<32x128xf32>
    %c0_7 = arith.constant 0 : index
    %c0_8 = arith.constant 0 : index
    %4 = vector.load %arg4[%c0_7, %c0_8] : memref<1x128xf32, #tpu.memory_space<vmem>>, vector<1x128xf32>
    %c0_9 = arith.constant 0 : index
    %c0_10 = arith.constant 0 : index
    %5 = vector.load %arg5[%c0_9, %c0_10] : memref<64x128xf32, #tpu.memory_space<vmem>>, vector<64x128xf32>
    %c0_11 = arith.constant 0 : index
    %c0_12 = arith.constant 0 : index
    %6 = vector.load %arg6[%c0_11, %c0_12] : memref<1x128xf32, #tpu.memory_space<vmem>>, vector<1x128xf32>
    %c0_13 = arith.constant 0 : index
    %c0_14 = arith.constant 0 : index
    %7 = vector.load %arg7[%c0_13, %c0_14] : memref<2x128xf32, #tpu.memory_space<vmem>>, vector<2x128xf32>
    %c0_15 = arith.constant 0 : index
    %c0_16 = arith.constant 0 : index
    %8 = vector.load %arg8[%c0_15, %c0_16] : memref<6x128xf32, #tpu.memory_space<vmem>>, vector<6x128xf32>
    %c0_17 = arith.constant 0 : index
    %c0_18 = arith.constant 0 : index
    %9 = vector.load %arg9[%c0_17, %c0_18] : memref<32x128xf32, #tpu.memory_space<vmem>>, vector<32x128xf32>
    %c0_19 = arith.constant 0 : index
    %c0_20 = arith.constant 0 : index
    %10 = vector.load %arg10[%c0_19, %c0_20] : memref<1x128xf32, #tpu.memory_space<vmem>>, vector<1x128xf32>
    %c0_21 = arith.constant 0 : index
    %c0_22 = arith.constant 0 : index
    %11 = vector.load %arg11[%c0_21, %c0_22] : memref<64x128xf32, #tpu.memory_space<vmem>>, vector<64x128xf32>
    %c0_23 = arith.constant 0 : index
    %c0_24 = arith.constant 0 : index
    %12 = vector.load %arg12[%c0_23, %c0_24] : memref<1x128xf32, #tpu.memory_space<vmem>>, vector<1x128xf32>
    %c0_25 = arith.constant 0 : index
    %c0_26 = arith.constant 0 : index
    %13 = vector.load %arg13[%c0_25, %c0_26] : memref<32x8xf32, #tpu.memory_space<vmem>>, vector<32x8xf32>
    %c0_27 = arith.constant 0 : index
    %c0_28 = arith.constant 0 : index
    %14 = vector.load %arg14[%c0_27, %c0_28] : memref<1x8xf32, #tpu.memory_space<vmem>>, vector<1x8xf32>
    %c0_29 = arith.constant 0 : index
    %c0_30 = arith.constant 0 : index
    %15 = vector.load %arg15[%c0_29, %c0_30] : memref<32x128xf32, #tpu.memory_space<vmem>>, vector<32x128xf32>
    %c0_31 = arith.constant 0 : index
    %c0_32 = arith.constant 0 : index
    %16 = vector.load %arg16[%c0_31, %c0_32] : memref<1x128xf32, #tpu.memory_space<vmem>>, vector<1x128xf32>
    %cst = arith.constant dense<0.000000e+00> : vector<32x128xf32>
    %17 = tpu.matmul %0, %2, %cst {dimension_numbers = #tpu.dot_dimension_numbers<[1], [0], [0], [1], [0, 0, 1, 1], [], []>} : vector<32x8xf32>, vector<8x128xf32>, vector<32x128xf32> -> vector<32x128xf32>
    %18 = vector.broadcast %4 : vector<1x128xf32> to vector<32x128xf32>
    %19 = arith.addf %17, %18 : vector<32x128xf32>
    %cst_33 = arith.constant dense<0.000000e+00> : vector<20x128xf32>
    %20 = tpu.matmul %1, %8, %cst_33 {dimension_numbers = #tpu.dot_dimension_numbers<[1], [0], [0], [1], [0, 0, 1, 1], [], []>} : vector<20x6xf32>, vector<6x128xf32>, vector<20x128xf32> -> vector<20x128xf32>
    %21 = vector.broadcast %10 : vector<1x128xf32> to vector<20x128xf32>
    %22 = arith.addf %20, %21 : vector<20x128xf32>
    %cst_34 = arith.constant 0.000000e+00 : f32
    %23 = vector.broadcast %cst_34 : f32 to vector<4x32xf32>
    %24 = vector.extract_strided_slice %19 {offsets = [0, 0], sizes = [4, 128], strides = [1, 1]} : vector<32x128xf32> to vector<4x128xf32>
    %cst_35 = arith.constant dense<0.000000e+00> : vector<4x128xf32>
    %25 = tpu.matmul %23, %3, %cst_35 {dimension_numbers = #tpu.dot_dimension_numbers<[1], [0], [0], [1], [0, 0, 1, 1], [], []>} : vector<4x32xf32>, vector<32x128xf32>, vector<4x128xf32> -> vector<4x128xf32>
    %26 = arith.addf %24, %25 : vector<4x128xf32>
    %27 = arith.negf %26 : vector<4x128xf32>
    %28 = math.exp %27 : vector<4x128xf32>
    %cst_36 = arith.constant 1.000000e+00 : f32
    %29 = vector.broadcast %cst_36 : f32 to vector<4x128xf32>
    %30 = arith.addf %29, %28 : vector<4x128xf32>
    %31 = arith.divf %29, %30 : vector<4x128xf32>
    %32 = math.tanh %26 : vector<4x128xf32>
    %33 = vector.extract_strided_slice %31 {offsets = [0, 0], sizes = [4, 32], strides = [1, 1]} : vector<4x128xf32> to vector<4x32xf32>
    %34 = vector.extract_strided_slice %31 {offsets = [0, 32], sizes = [4, 32], strides = [1, 1]} : vector<4x128xf32> to vector<4x32xf32>
    %35 = vector.extract_strided_slice %32 {offsets = [0, 64], sizes = [4, 32], strides = [1, 1]} : vector<4x128xf32> to vector<4x32xf32>
    %36 = vector.extract_strided_slice %31 {offsets = [0, 96], sizes = [4, 32], strides = [1, 1]} : vector<4x128xf32> to vector<4x32xf32>
    %37 = arith.mulf %34, %23 : vector<4x32xf32>
    %38 = arith.mulf %33, %35 : vector<4x32xf32>
    %39 = arith.addf %37, %38 : vector<4x32xf32>
    %40 = math.tanh %39 : vector<4x32xf32>
    %41 = arith.mulf %36, %40 : vector<4x32xf32>
    %42 = tpu.concatenate %41, %23 in 1 : vector<4x32xf32>, vector<4x32xf32> -> vector<4x64xf32>
    %cst_37 = arith.constant dense<0.000000e+00> : vector<4x128xf32>
    %43 = tpu.matmul %42, %5, %cst_37 {dimension_numbers = #tpu.dot_dimension_numbers<[1], [0], [0], [1], [0, 0, 1, 1], [], []>} : vector<4x64xf32>, vector<64x128xf32>, vector<4x128xf32> -> vector<4x128xf32>
    %44 = vector.broadcast %6 : vector<1x128xf32> to vector<4x128xf32>
    %45 = arith.addf %43, %44 : vector<4x128xf32>
    %46 = arith.negf %45 : vector<4x128xf32>
    %47 = math.exp %46 : vector<4x128xf32>
    %cst_38 = arith.constant 1.000000e+00 : f32
    %48 = vector.broadcast %cst_38 : f32 to vector<4x128xf32>
    %49 = arith.addf %48, %47 : vector<4x128xf32>
    %50 = arith.divf %48, %49 : vector<4x128xf32>
    %51 = math.tanh %45 : vector<4x128xf32>
    %52 = vector.extract_strided_slice %50 {offsets = [0, 0], sizes = [4, 32], strides = [1, 1]} : vector<4x128xf32> to vector<4x32xf32>
    %53 = vector.extract_strided_slice %50 {offsets = [0, 32], sizes = [4, 32], strides = [1, 1]} : vector<4x128xf32> to vector<4x32xf32>
    %54 = vector.extract_strided_slice %51 {offsets = [0, 64], sizes = [4, 32], strides = [1, 1]} : vector<4x128xf32> to vector<4x32xf32>
    %55 = vector.extract_strided_slice %50 {offsets = [0, 96], sizes = [4, 32], strides = [1, 1]} : vector<4x128xf32> to vector<4x32xf32>
    %56 = arith.mulf %53, %23 : vector<4x32xf32>
    %57 = arith.mulf %52, %54 : vector<4x32xf32>
    %58 = arith.addf %56, %57 : vector<4x32xf32>
    %59 = math.tanh %58 : vector<4x32xf32>
    %60 = arith.mulf %55, %59 : vector<4x32xf32>
    %61 = vector.extract_strided_slice %19 {offsets = [4, 0], sizes = [4, 128], strides = [1, 1]} : vector<32x128xf32> to vector<4x128xf32>
    %cst_39 = arith.constant dense<0.000000e+00> : vector<4x128xf32>
    %62 = tpu.matmul %41, %3, %cst_39 {dimension_numbers = #tpu.dot_dimension_numbers<[1], [0], [0], [1], [0, 0, 1, 1], [], []>} : vector<4x32xf32>, vector<32x128xf32>, vector<4x128xf32> -> vector<4x128xf32>
    %63 = arith.addf %61, %62 : vector<4x128xf32>
    %64 = arith.negf %63 : vector<4x128xf32>
    %65 = math.exp %64 : vector<4x128xf32>
    %cst_40 = arith.constant 1.000000e+00 : f32
    %66 = vector.broadcast %cst_40 : f32 to vector<4x128xf32>
    %67 = arith.addf %66, %65 : vector<4x128xf32>
    %68 = arith.divf %66, %67 : vector<4x128xf32>
    %69 = math.tanh %63 : vector<4x128xf32>
    %70 = vector.extract_strided_slice %68 {offsets = [0, 0], sizes = [4, 32], strides = [1, 1]} : vector<4x128xf32> to vector<4x32xf32>
    %71 = vector.extract_strided_slice %68 {offsets = [0, 32], sizes = [4, 32], strides = [1, 1]} : vector<4x128xf32> to vector<4x32xf32>
    %72 = vector.extract_strided_slice %69 {offsets = [0, 64], sizes = [4, 32], strides = [1, 1]} : vector<4x128xf32> to vector<4x32xf32>
    %73 = vector.extract_strided_slice %68 {offsets = [0, 96], sizes = [4, 32], strides = [1, 1]} : vector<4x128xf32> to vector<4x32xf32>
    %74 = arith.mulf %71, %39 : vector<4x32xf32>
    %75 = arith.mulf %70, %72 : vector<4x32xf32>
    %76 = arith.addf %74, %75 : vector<4x32xf32>
    %77 = math.tanh %76 : vector<4x32xf32>
    %78 = arith.mulf %73, %77 : vector<4x32xf32>
    %79 = tpu.concatenate %78, %60 in 1 : vector<4x32xf32>, vector<4x32xf32> -> vector<4x64xf32>
    %cst_41 = arith.constant dense<0.000000e+00> : vector<4x128xf32>
    %80 = tpu.matmul %79, %5, %cst_41 {dimension_numbers = #tpu.dot_dimension_numbers<[1], [0], [0], [1], [0, 0, 1, 1], [], []>} : vector<4x64xf32>, vector<64x128xf32>, vector<4x128xf32> -> vector<4x128xf32>
    %81 = vector.broadcast %6 : vector<1x128xf32> to vector<4x128xf32>
    %82 = arith.addf %80, %81 : vector<4x128xf32>
    %83 = arith.negf %82 : vector<4x128xf32>
    %84 = math.exp %83 : vector<4x128xf32>
    %cst_42 = arith.constant 1.000000e+00 : f32
    %85 = vector.broadcast %cst_42 : f32 to vector<4x128xf32>
    %86 = arith.addf %85, %84 : vector<4x128xf32>
    %87 = arith.divf %85, %86 : vector<4x128xf32>
    %88 = math.tanh %82 : vector<4x128xf32>
    %89 = vector.extract_strided_slice %87 {offsets = [0, 0], sizes = [4, 32], strides = [1, 1]} : vector<4x128xf32> to vector<4x32xf32>
    %90 = vector.extract_strided_slice %87 {offsets = [0, 32], sizes = [4, 32], strides = [1, 1]} : vector<4x128xf32> to vector<4x32xf32>
    %91 = vector.extract_strided_slice %88 {offsets = [0, 64], sizes = [4, 32], strides = [1, 1]} : vector<4x128xf32> to vector<4x32xf32>
    %92 = vector.extract_strided_slice %87 {offsets = [0, 96], sizes = [4, 32], strides = [1, 1]} : vector<4x128xf32> to vector<4x32xf32>
    %93 = arith.mulf %90, %58 : vector<4x32xf32>
    %94 = arith.mulf %89, %91 : vector<4x32xf32>
    %95 = arith.addf %93, %94 : vector<4x32xf32>
    %96 = math.tanh %95 : vector<4x32xf32>
    %97 = arith.mulf %92, %96 : vector<4x32xf32>
    %98 = vector.extract_strided_slice %19 {offsets = [8, 0], sizes = [4, 128], strides = [1, 1]} : vector<32x128xf32> to vector<4x128xf32>
    %cst_43 = arith.constant dense<0.000000e+00> : vector<4x128xf32>
    %99 = tpu.matmul %78, %3, %cst_43 {dimension_numbers = #tpu.dot_dimension_numbers<[1], [0], [0], [1], [0, 0, 1, 1], [], []>} : vector<4x32xf32>, vector<32x128xf32>, vector<4x128xf32> -> vector<4x128xf32>
    %100 = arith.addf %98, %99 : vector<4x128xf32>
    %101 = arith.negf %100 : vector<4x128xf32>
    %102 = math.exp %101 : vector<4x128xf32>
    %cst_44 = arith.constant 1.000000e+00 : f32
    %103 = vector.broadcast %cst_44 : f32 to vector<4x128xf32>
    %104 = arith.addf %103, %102 : vector<4x128xf32>
    %105 = arith.divf %103, %104 : vector<4x128xf32>
    %106 = math.tanh %100 : vector<4x128xf32>
    %107 = vector.extract_strided_slice %105 {offsets = [0, 0], sizes = [4, 32], strides = [1, 1]} : vector<4x128xf32> to vector<4x32xf32>
    %108 = vector.extract_strided_slice %105 {offsets = [0, 32], sizes = [4, 32], strides = [1, 1]} : vector<4x128xf32> to vector<4x32xf32>
    %109 = vector.extract_strided_slice %106 {offsets = [0, 64], sizes = [4, 32], strides = [1, 1]} : vector<4x128xf32> to vector<4x32xf32>
    %110 = vector.extract_strided_slice %105 {offsets = [0, 96], sizes = [4, 32], strides = [1, 1]} : vector<4x128xf32> to vector<4x32xf32>
    %111 = arith.mulf %108, %76 : vector<4x32xf32>
    %112 = arith.mulf %107, %109 : vector<4x32xf32>
    %113 = arith.addf %111, %112 : vector<4x32xf32>
    %114 = math.tanh %113 : vector<4x32xf32>
    %115 = arith.mulf %110, %114 : vector<4x32xf32>
    %116 = tpu.concatenate %115, %97 in 1 : vector<4x32xf32>, vector<4x32xf32> -> vector<4x64xf32>
    %cst_45 = arith.constant dense<0.000000e+00> : vector<4x128xf32>
    %117 = tpu.matmul %116, %5, %cst_45 {dimension_numbers = #tpu.dot_dimension_numbers<[1], [0], [0], [1], [0, 0, 1, 1], [], []>} : vector<4x64xf32>, vector<64x128xf32>, vector<4x128xf32> -> vector<4x128xf32>
    %118 = vector.broadcast %6 : vector<1x128xf32> to vector<4x128xf32>
    %119 = arith.addf %117, %118 : vector<4x128xf32>
    %120 = arith.negf %119 : vector<4x128xf32>
    %121 = math.exp %120 : vector<4x128xf32>
    %cst_46 = arith.constant 1.000000e+00 : f32
    %122 = vector.broadcast %cst_46 : f32 to vector<4x128xf32>
    %123 = arith.addf %122, %121 : vector<4x128xf32>
    %124 = arith.divf %122, %123 : vector<4x128xf32>
    %125 = math.tanh %119 : vector<4x128xf32>
    %126 = vector.extract_strided_slice %124 {offsets = [0, 0], sizes = [4, 32], strides = [1, 1]} : vector<4x128xf32> to vector<4x32xf32>
    %127 = vector.extract_strided_slice %124 {offsets = [0, 32], sizes = [4, 32], strides = [1, 1]} : vector<4x128xf32> to vector<4x32xf32>
    %128 = vector.extract_strided_slice %125 {offsets = [0, 64], sizes = [4, 32], strides = [1, 1]} : vector<4x128xf32> to vector<4x32xf32>
    %129 = vector.extract_strided_slice %124 {offsets = [0, 96], sizes = [4, 32], strides = [1, 1]} : vector<4x128xf32> to vector<4x32xf32>
    %130 = arith.mulf %127, %95 : vector<4x32xf32>
    %131 = arith.mulf %126, %128 : vector<4x32xf32>
    %132 = arith.addf %130, %131 : vector<4x32xf32>
    %133 = math.tanh %132 : vector<4x32xf32>
    %134 = arith.mulf %129, %133 : vector<4x32xf32>
    %135 = vector.extract_strided_slice %19 {offsets = [12, 0], sizes = [4, 128], strides = [1, 1]} : vector<32x128xf32> to vector<4x128xf32>
    %cst_47 = arith.constant dense<0.000000e+00> : vector<4x128xf32>
    %136 = tpu.matmul %115, %3, %cst_47 {dimension_numbers = #tpu.dot_dimension_numbers<[1], [0], [0], [1], [0, 0, 1, 1], [], []>} : vector<4x32xf32>, vector<32x128xf32>, vector<4x128xf32> -> vector<4x128xf32>
    %137 = arith.addf %135, %136 : vector<4x128xf32>
    %138 = arith.negf %137 : vector<4x128xf32>
    %139 = math.exp %138 : vector<4x128xf32>
    %cst_48 = arith.constant 1.000000e+00 : f32
    %140 = vector.broadcast %cst_48 : f32 to vector<4x128xf32>
    %141 = arith.addf %140, %139 : vector<4x128xf32>
    %142 = arith.divf %140, %141 : vector<4x128xf32>
    %143 = math.tanh %137 : vector<4x128xf32>
    %144 = vector.extract_strided_slice %142 {offsets = [0, 0], sizes = [4, 32], strides = [1, 1]} : vector<4x128xf32> to vector<4x32xf32>
    %145 = vector.extract_strided_slice %142 {offsets = [0, 32], sizes = [4, 32], strides = [1, 1]} : vector<4x128xf32> to vector<4x32xf32>
    %146 = vector.extract_strided_slice %143 {offsets = [0, 64], sizes = [4, 32], strides = [1, 1]} : vector<4x128xf32> to vector<4x32xf32>
    %147 = vector.extract_strided_slice %142 {offsets = [0, 96], sizes = [4, 32], strides = [1, 1]} : vector<4x128xf32> to vector<4x32xf32>
    %148 = arith.mulf %145, %113 : vector<4x32xf32>
    %149 = arith.mulf %144, %146 : vector<4x32xf32>
    %150 = arith.addf %148, %149 : vector<4x32xf32>
    %151 = math.tanh %150 : vector<4x32xf32>
    %152 = arith.mulf %147, %151 : vector<4x32xf32>
    %153 = tpu.concatenate %152, %134 in 1 : vector<4x32xf32>, vector<4x32xf32> -> vector<4x64xf32>
    %cst_49 = arith.constant dense<0.000000e+00> : vector<4x128xf32>
    %154 = tpu.matmul %153, %5, %cst_49 {dimension_numbers = #tpu.dot_dimension_numbers<[1], [0], [0], [1], [0, 0, 1, 1], [], []>} : vector<4x64xf32>, vector<64x128xf32>, vector<4x128xf32> -> vector<4x128xf32>
    %155 = vector.broadcast %6 : vector<1x128xf32> to vector<4x128xf32>
    %156 = arith.addf %154, %155 : vector<4x128xf32>
    %157 = arith.negf %156 : vector<4x128xf32>
    %158 = math.exp %157 : vector<4x128xf32>
    %cst_50 = arith.constant 1.000000e+00 : f32
    %159 = vector.broadcast %cst_50 : f32 to vector<4x128xf32>
    %160 = arith.addf %159, %158 : vector<4x128xf32>
    %161 = arith.divf %159, %160 : vector<4x128xf32>
    %162 = math.tanh %156 : vector<4x128xf32>
    %163 = vector.extract_strided_slice %161 {offsets = [0, 0], sizes = [4, 32], strides = [1, 1]} : vector<4x128xf32> to vector<4x32xf32>
    %164 = vector.extract_strided_slice %161 {offsets = [0, 32], sizes = [4, 32], strides = [1, 1]} : vector<4x128xf32> to vector<4x32xf32>
    %165 = vector.extract_strided_slice %162 {offsets = [0, 64], sizes = [4, 32], strides = [1, 1]} : vector<4x128xf32> to vector<4x32xf32>
    %166 = vector.extract_strided_slice %161 {offsets = [0, 96], sizes = [4, 32], strides = [1, 1]} : vector<4x128xf32> to vector<4x32xf32>
    %167 = arith.mulf %164, %132 : vector<4x32xf32>
    %168 = arith.mulf %163, %165 : vector<4x32xf32>
    %169 = arith.addf %167, %168 : vector<4x32xf32>
    %170 = math.tanh %169 : vector<4x32xf32>
    %171 = arith.mulf %166, %170 : vector<4x32xf32>
    %172 = vector.extract_strided_slice %19 {offsets = [16, 0], sizes = [4, 128], strides = [1, 1]} : vector<32x128xf32> to vector<4x128xf32>
    %cst_51 = arith.constant dense<0.000000e+00> : vector<4x128xf32>
    %173 = tpu.matmul %152, %3, %cst_51 {dimension_numbers = #tpu.dot_dimension_numbers<[1], [0], [0], [1], [0, 0, 1, 1], [], []>} : vector<4x32xf32>, vector<32x128xf32>, vector<4x128xf32> -> vector<4x128xf32>
    %174 = arith.addf %172, %173 : vector<4x128xf32>
    %175 = arith.negf %174 : vector<4x128xf32>
    %176 = math.exp %175 : vector<4x128xf32>
    %cst_52 = arith.constant 1.000000e+00 : f32
    %177 = vector.broadcast %cst_52 : f32 to vector<4x128xf32>
    %178 = arith.addf %177, %176 : vector<4x128xf32>
    %179 = arith.divf %177, %178 : vector<4x128xf32>
    %180 = math.tanh %174 : vector<4x128xf32>
    %181 = vector.extract_strided_slice %179 {offsets = [0, 0], sizes = [4, 32], strides = [1, 1]} : vector<4x128xf32> to vector<4x32xf32>
    %182 = vector.extract_strided_slice %179 {offsets = [0, 32], sizes = [4, 32], strides = [1, 1]} : vector<4x128xf32> to vector<4x32xf32>
    %183 = vector.extract_strided_slice %180 {offsets = [0, 64], sizes = [4, 32], strides = [1, 1]} : vector<4x128xf32> to vector<4x32xf32>
    %184 = vector.extract_strided_slice %179 {offsets = [0, 96], sizes = [4, 32], strides = [1, 1]} : vector<4x128xf32> to vector<4x32xf32>
    %185 = arith.mulf %182, %150 : vector<4x32xf32>
    %186 = arith.mulf %181, %183 : vector<4x32xf32>
    %187 = arith.addf %185, %186 : vector<4x32xf32>
    %188 = math.tanh %187 : vector<4x32xf32>
    %189 = arith.mulf %184, %188 : vector<4x32xf32>
    %190 = tpu.concatenate %189, %171 in 1 : vector<4x32xf32>, vector<4x32xf32> -> vector<4x64xf32>
    %cst_53 = arith.constant dense<0.000000e+00> : vector<4x128xf32>
    %191 = tpu.matmul %190, %5, %cst_53 {dimension_numbers = #tpu.dot_dimension_numbers<[1], [0], [0], [1], [0, 0, 1, 1], [], []>} : vector<4x64xf32>, vector<64x128xf32>, vector<4x128xf32> -> vector<4x128xf32>
    %192 = vector.broadcast %6 : vector<1x128xf32> to vector<4x128xf32>
    %193 = arith.addf %191, %192 : vector<4x128xf32>
    %194 = arith.negf %193 : vector<4x128xf32>
    %195 = math.exp %194 : vector<4x128xf32>
    %cst_54 = arith.constant 1.000000e+00 : f32
    %196 = vector.broadcast %cst_54 : f32 to vector<4x128xf32>
    %197 = arith.addf %196, %195 : vector<4x128xf32>
    %198 = arith.divf %196, %197 : vector<4x128xf32>
    %199 = math.tanh %193 : vector<4x128xf32>
    %200 = vector.extract_strided_slice %198 {offsets = [0, 0], sizes = [4, 32], strides = [1, 1]} : vector<4x128xf32> to vector<4x32xf32>
    %201 = vector.extract_strided_slice %198 {offsets = [0, 32], sizes = [4, 32], strides = [1, 1]} : vector<4x128xf32> to vector<4x32xf32>
    %202 = vector.extract_strided_slice %199 {offsets = [0, 64], sizes = [4, 32], strides = [1, 1]} : vector<4x128xf32> to vector<4x32xf32>
    %203 = vector.extract_strided_slice %198 {offsets = [0, 96], sizes = [4, 32], strides = [1, 1]} : vector<4x128xf32> to vector<4x32xf32>
    %204 = arith.mulf %201, %169 : vector<4x32xf32>
    %205 = arith.mulf %200, %202 : vector<4x32xf32>
    %206 = arith.addf %204, %205 : vector<4x32xf32>
    %207 = math.tanh %206 : vector<4x32xf32>
    %208 = arith.mulf %203, %207 : vector<4x32xf32>
    %209 = vector.extract_strided_slice %19 {offsets = [20, 0], sizes = [4, 128], strides = [1, 1]} : vector<32x128xf32> to vector<4x128xf32>
    %cst_55 = arith.constant dense<0.000000e+00> : vector<4x128xf32>
    %210 = tpu.matmul %189, %3, %cst_55 {dimension_numbers = #tpu.dot_dimension_numbers<[1], [0], [0], [1], [0, 0, 1, 1], [], []>} : vector<4x32xf32>, vector<32x128xf32>, vector<4x128xf32> -> vector<4x128xf32>
    %211 = arith.addf %209, %210 : vector<4x128xf32>
    %212 = arith.negf %211 : vector<4x128xf32>
    %213 = math.exp %212 : vector<4x128xf32>
    %cst_56 = arith.constant 1.000000e+00 : f32
    %214 = vector.broadcast %cst_56 : f32 to vector<4x128xf32>
    %215 = arith.addf %214, %213 : vector<4x128xf32>
    %216 = arith.divf %214, %215 : vector<4x128xf32>
    %217 = math.tanh %211 : vector<4x128xf32>
    %218 = vector.extract_strided_slice %216 {offsets = [0, 0], sizes = [4, 32], strides = [1, 1]} : vector<4x128xf32> to vector<4x32xf32>
    %219 = vector.extract_strided_slice %216 {offsets = [0, 32], sizes = [4, 32], strides = [1, 1]} : vector<4x128xf32> to vector<4x32xf32>
    %220 = vector.extract_strided_slice %217 {offsets = [0, 64], sizes = [4, 32], strides = [1, 1]} : vector<4x128xf32> to vector<4x32xf32>
    %221 = vector.extract_strided_slice %216 {offsets = [0, 96], sizes = [4, 32], strides = [1, 1]} : vector<4x128xf32> to vector<4x32xf32>
    %222 = arith.mulf %219, %187 : vector<4x32xf32>
    %223 = arith.mulf %218, %220 : vector<4x32xf32>
    %224 = arith.addf %222, %223 : vector<4x32xf32>
    %225 = math.tanh %224 : vector<4x32xf32>
    %226 = arith.mulf %221, %225 : vector<4x32xf32>
    %227 = tpu.concatenate %226, %208 in 1 : vector<4x32xf32>, vector<4x32xf32> -> vector<4x64xf32>
    %cst_57 = arith.constant dense<0.000000e+00> : vector<4x128xf32>
    %228 = tpu.matmul %227, %5, %cst_57 {dimension_numbers = #tpu.dot_dimension_numbers<[1], [0], [0], [1], [0, 0, 1, 1], [], []>} : vector<4x64xf32>, vector<64x128xf32>, vector<4x128xf32> -> vector<4x128xf32>
    %229 = vector.broadcast %6 : vector<1x128xf32> to vector<4x128xf32>
    %230 = arith.addf %228, %229 : vector<4x128xf32>
    %231 = arith.negf %230 : vector<4x128xf32>
    %232 = math.exp %231 : vector<4x128xf32>
    %cst_58 = arith.constant 1.000000e+00 : f32
    %233 = vector.broadcast %cst_58 : f32 to vector<4x128xf32>
    %234 = arith.addf %233, %232 : vector<4x128xf32>
    %235 = arith.divf %233, %234 : vector<4x128xf32>
    %236 = math.tanh %230 : vector<4x128xf32>
    %237 = vector.extract_strided_slice %235 {offsets = [0, 0], sizes = [4, 32], strides = [1, 1]} : vector<4x128xf32> to vector<4x32xf32>
    %238 = vector.extract_strided_slice %235 {offsets = [0, 32], sizes = [4, 32], strides = [1, 1]} : vector<4x128xf32> to vector<4x32xf32>
    %239 = vector.extract_strided_slice %236 {offsets = [0, 64], sizes = [4, 32], strides = [1, 1]} : vector<4x128xf32> to vector<4x32xf32>
    %240 = vector.extract_strided_slice %235 {offsets = [0, 96], sizes = [4, 32], strides = [1, 1]} : vector<4x128xf32> to vector<4x32xf32>
    %241 = arith.mulf %238, %206 : vector<4x32xf32>
    %242 = arith.mulf %237, %239 : vector<4x32xf32>
    %243 = arith.addf %241, %242 : vector<4x32xf32>
    %244 = math.tanh %243 : vector<4x32xf32>
    %245 = arith.mulf %240, %244 : vector<4x32xf32>
    %246 = vector.extract_strided_slice %19 {offsets = [24, 0], sizes = [4, 128], strides = [1, 1]} : vector<32x128xf32> to vector<4x128xf32>
    %cst_59 = arith.constant dense<0.000000e+00> : vector<4x128xf32>
    %247 = tpu.matmul %226, %3, %cst_59 {dimension_numbers = #tpu.dot_dimension_numbers<[1], [0], [0], [1], [0, 0, 1, 1], [], []>} : vector<4x32xf32>, vector<32x128xf32>, vector<4x128xf32> -> vector<4x128xf32>
    %248 = arith.addf %246, %247 : vector<4x128xf32>
    %249 = arith.negf %248 : vector<4x128xf32>
    %250 = math.exp %249 : vector<4x128xf32>
    %cst_60 = arith.constant 1.000000e+00 : f32
    %251 = vector.broadcast %cst_60 : f32 to vector<4x128xf32>
    %252 = arith.addf %251, %250 : vector<4x128xf32>
    %253 = arith.divf %251, %252 : vector<4x128xf32>
    %254 = math.tanh %248 : vector<4x128xf32>
    %255 = vector.extract_strided_slice %253 {offsets = [0, 0], sizes = [4, 32], strides = [1, 1]} : vector<4x128xf32> to vector<4x32xf32>
    %256 = vector.extract_strided_slice %253 {offsets = [0, 32], sizes = [4, 32], strides = [1, 1]} : vector<4x128xf32> to vector<4x32xf32>
    %257 = vector.extract_strided_slice %254 {offsets = [0, 64], sizes = [4, 32], strides = [1, 1]} : vector<4x128xf32> to vector<4x32xf32>
    %258 = vector.extract_strided_slice %253 {offsets = [0, 96], sizes = [4, 32], strides = [1, 1]} : vector<4x128xf32> to vector<4x32xf32>
    %259 = arith.mulf %256, %224 : vector<4x32xf32>
    %260 = arith.mulf %255, %257 : vector<4x32xf32>
    %261 = arith.addf %259, %260 : vector<4x32xf32>
    %262 = math.tanh %261 : vector<4x32xf32>
    %263 = arith.mulf %258, %262 : vector<4x32xf32>
    %264 = tpu.concatenate %263, %245 in 1 : vector<4x32xf32>, vector<4x32xf32> -> vector<4x64xf32>
    %cst_61 = arith.constant dense<0.000000e+00> : vector<4x128xf32>
    %265 = tpu.matmul %264, %5, %cst_61 {dimension_numbers = #tpu.dot_dimension_numbers<[1], [0], [0], [1], [0, 0, 1, 1], [], []>} : vector<4x64xf32>, vector<64x128xf32>, vector<4x128xf32> -> vector<4x128xf32>
    %266 = vector.broadcast %6 : vector<1x128xf32> to vector<4x128xf32>
    %267 = arith.addf %265, %266 : vector<4x128xf32>
    %268 = arith.negf %267 : vector<4x128xf32>
    %269 = math.exp %268 : vector<4x128xf32>
    %cst_62 = arith.constant 1.000000e+00 : f32
    %270 = vector.broadcast %cst_62 : f32 to vector<4x128xf32>
    %271 = arith.addf %270, %269 : vector<4x128xf32>
    %272 = arith.divf %270, %271 : vector<4x128xf32>
    %273 = math.tanh %267 : vector<4x128xf32>
    %274 = vector.extract_strided_slice %272 {offsets = [0, 0], sizes = [4, 32], strides = [1, 1]} : vector<4x128xf32> to vector<4x32xf32>
    %275 = vector.extract_strided_slice %272 {offsets = [0, 32], sizes = [4, 32], strides = [1, 1]} : vector<4x128xf32> to vector<4x32xf32>
    %276 = vector.extract_strided_slice %273 {offsets = [0, 64], sizes = [4, 32], strides = [1, 1]} : vector<4x128xf32> to vector<4x32xf32>
    %277 = vector.extract_strided_slice %272 {offsets = [0, 96], sizes = [4, 32], strides = [1, 1]} : vector<4x128xf32> to vector<4x32xf32>
    %278 = arith.mulf %275, %243 : vector<4x32xf32>
    %279 = arith.mulf %274, %276 : vector<4x32xf32>
    %280 = arith.addf %278, %279 : vector<4x32xf32>
    %281 = math.tanh %280 : vector<4x32xf32>
    %282 = arith.mulf %277, %281 : vector<4x32xf32>
    %283 = vector.extract_strided_slice %19 {offsets = [28, 0], sizes = [4, 128], strides = [1, 1]} : vector<32x128xf32> to vector<4x128xf32>
    %cst_63 = arith.constant dense<0.000000e+00> : vector<4x128xf32>
    %284 = tpu.matmul %263, %3, %cst_63 {dimension_numbers = #tpu.dot_dimension_numbers<[1], [0], [0], [1], [0, 0, 1, 1], [], []>} : vector<4x32xf32>, vector<32x128xf32>, vector<4x128xf32> -> vector<4x128xf32>
    %285 = arith.addf %283, %284 : vector<4x128xf32>
    %286 = arith.negf %285 : vector<4x128xf32>
    %287 = math.exp %286 : vector<4x128xf32>
    %cst_64 = arith.constant 1.000000e+00 : f32
    %288 = vector.broadcast %cst_64 : f32 to vector<4x128xf32>
    %289 = arith.addf %288, %287 : vector<4x128xf32>
    %290 = arith.divf %288, %289 : vector<4x128xf32>
    %291 = math.tanh %285 : vector<4x128xf32>
    %292 = vector.extract_strided_slice %290 {offsets = [0, 0], sizes = [4, 32], strides = [1, 1]} : vector<4x128xf32> to vector<4x32xf32>
    %293 = vector.extract_strided_slice %290 {offsets = [0, 32], sizes = [4, 32], strides = [1, 1]} : vector<4x128xf32> to vector<4x32xf32>
    %294 = vector.extract_strided_slice %291 {offsets = [0, 64], sizes = [4, 32], strides = [1, 1]} : vector<4x128xf32> to vector<4x32xf32>
    %295 = vector.extract_strided_slice %290 {offsets = [0, 96], sizes = [4, 32], strides = [1, 1]} : vector<4x128xf32> to vector<4x32xf32>
    %296 = arith.mulf %293, %261 : vector<4x32xf32>
    %297 = arith.mulf %292, %294 : vector<4x32xf32>
    %298 = arith.addf %296, %297 : vector<4x32xf32>
    %299 = math.tanh %298 : vector<4x32xf32>
    %300 = arith.mulf %295, %299 : vector<4x32xf32>
    %301 = tpu.concatenate %300, %282 in 1 : vector<4x32xf32>, vector<4x32xf32> -> vector<4x64xf32>
    %cst_65 = arith.constant dense<0.000000e+00> : vector<4x128xf32>
    %302 = tpu.matmul %301, %5, %cst_65 {dimension_numbers = #tpu.dot_dimension_numbers<[1], [0], [0], [1], [0, 0, 1, 1], [], []>} : vector<4x64xf32>, vector<64x128xf32>, vector<4x128xf32> -> vector<4x128xf32>
    %303 = vector.broadcast %6 : vector<1x128xf32> to vector<4x128xf32>
    %304 = arith.addf %302, %303 : vector<4x128xf32>
    %305 = arith.negf %304 : vector<4x128xf32>
    %306 = math.exp %305 : vector<4x128xf32>
    %cst_66 = arith.constant 1.000000e+00 : f32
    %307 = vector.broadcast %cst_66 : f32 to vector<4x128xf32>
    %308 = arith.addf %307, %306 : vector<4x128xf32>
    %309 = arith.divf %307, %308 : vector<4x128xf32>
    %310 = math.tanh %304 : vector<4x128xf32>
    %311 = vector.extract_strided_slice %309 {offsets = [0, 0], sizes = [4, 32], strides = [1, 1]} : vector<4x128xf32> to vector<4x32xf32>
    %312 = vector.extract_strided_slice %309 {offsets = [0, 32], sizes = [4, 32], strides = [1, 1]} : vector<4x128xf32> to vector<4x32xf32>
    %313 = vector.extract_strided_slice %310 {offsets = [0, 64], sizes = [4, 32], strides = [1, 1]} : vector<4x128xf32> to vector<4x32xf32>
    %314 = vector.extract_strided_slice %309 {offsets = [0, 96], sizes = [4, 32], strides = [1, 1]} : vector<4x128xf32> to vector<4x32xf32>
    %315 = arith.mulf %312, %280 : vector<4x32xf32>
    %316 = arith.mulf %311, %313 : vector<4x32xf32>
    %317 = arith.addf %315, %316 : vector<4x32xf32>
    %318 = math.tanh %317 : vector<4x32xf32>
    %319 = arith.mulf %314, %318 : vector<4x32xf32>
    %320 = vector.extract_strided_slice %0 {offsets = [28, 0], sizes = [4, 2], strides = [1, 1]} : vector<32x8xf32> to vector<4x2xf32>
    %cst_67 = arith.constant dense<0.000000e+00> : vector<4x128xf32>
    %321 = tpu.matmul %320, %7, %cst_67 {dimension_numbers = #tpu.dot_dimension_numbers<[1], [0], [0], [1], [0, 0, 1, 1], [], []>} : vector<4x2xf32>, vector<2x128xf32>, vector<4x128xf32> -> vector<4x128xf32>
    %322 = vector.extract_strided_slice %22 {offsets = [0, 0], sizes = [4, 128], strides = [1, 1]} : vector<20x128xf32> to vector<4x128xf32>
    %323 = arith.addf %322, %321 : vector<4x128xf32>
    %cst_68 = arith.constant dense<0.000000e+00> : vector<4x128xf32>
    %324 = tpu.matmul %300, %9, %cst_68 {dimension_numbers = #tpu.dot_dimension_numbers<[1], [0], [0], [1], [0, 0, 1, 1], [], []>} : vector<4x32xf32>, vector<32x128xf32>, vector<4x128xf32> -> vector<4x128xf32>
    %325 = arith.addf %323, %324 : vector<4x128xf32>
    %326 = arith.negf %325 : vector<4x128xf32>
    %327 = math.exp %326 : vector<4x128xf32>
    %cst_69 = arith.constant 1.000000e+00 : f32
    %328 = vector.broadcast %cst_69 : f32 to vector<4x128xf32>
    %329 = arith.addf %328, %327 : vector<4x128xf32>
    %330 = arith.divf %328, %329 : vector<4x128xf32>
    %331 = math.tanh %325 : vector<4x128xf32>
    %332 = vector.extract_strided_slice %330 {offsets = [0, 0], sizes = [4, 32], strides = [1, 1]} : vector<4x128xf32> to vector<4x32xf32>
    %333 = vector.extract_strided_slice %330 {offsets = [0, 32], sizes = [4, 32], strides = [1, 1]} : vector<4x128xf32> to vector<4x32xf32>
    %334 = vector.extract_strided_slice %331 {offsets = [0, 64], sizes = [4, 32], strides = [1, 1]} : vector<4x128xf32> to vector<4x32xf32>
    %335 = vector.extract_strided_slice %330 {offsets = [0, 96], sizes = [4, 32], strides = [1, 1]} : vector<4x128xf32> to vector<4x32xf32>
    %336 = arith.mulf %333, %298 : vector<4x32xf32>
    %337 = arith.mulf %332, %334 : vector<4x32xf32>
    %338 = arith.addf %336, %337 : vector<4x32xf32>
    %339 = math.tanh %338 : vector<4x32xf32>
    %340 = arith.mulf %335, %339 : vector<4x32xf32>
    %341 = tpu.concatenate %340, %319 in 1 : vector<4x32xf32>, vector<4x32xf32> -> vector<4x64xf32>
    %cst_70 = arith.constant dense<0.000000e+00> : vector<4x128xf32>
    %342 = tpu.matmul %341, %11, %cst_70 {dimension_numbers = #tpu.dot_dimension_numbers<[1], [0], [0], [1], [0, 0, 1, 1], [], []>} : vector<4x64xf32>, vector<64x128xf32>, vector<4x128xf32> -> vector<4x128xf32>
    %343 = vector.broadcast %12 : vector<1x128xf32> to vector<4x128xf32>
    %344 = arith.addf %342, %343 : vector<4x128xf32>
    %345 = arith.negf %344 : vector<4x128xf32>
    %346 = math.exp %345 : vector<4x128xf32>
    %cst_71 = arith.constant 1.000000e+00 : f32
    %347 = vector.broadcast %cst_71 : f32 to vector<4x128xf32>
    %348 = arith.addf %347, %346 : vector<4x128xf32>
    %349 = arith.divf %347, %348 : vector<4x128xf32>
    %350 = math.tanh %344 : vector<4x128xf32>
    %351 = vector.extract_strided_slice %349 {offsets = [0, 0], sizes = [4, 32], strides = [1, 1]} : vector<4x128xf32> to vector<4x32xf32>
    %352 = vector.extract_strided_slice %349 {offsets = [0, 32], sizes = [4, 32], strides = [1, 1]} : vector<4x128xf32> to vector<4x32xf32>
    %353 = vector.extract_strided_slice %350 {offsets = [0, 64], sizes = [4, 32], strides = [1, 1]} : vector<4x128xf32> to vector<4x32xf32>
    %354 = vector.extract_strided_slice %349 {offsets = [0, 96], sizes = [4, 32], strides = [1, 1]} : vector<4x128xf32> to vector<4x32xf32>
    %355 = arith.mulf %352, %317 : vector<4x32xf32>
    %356 = arith.mulf %351, %353 : vector<4x32xf32>
    %357 = arith.addf %355, %356 : vector<4x32xf32>
    %358 = math.tanh %357 : vector<4x32xf32>
    %359 = arith.mulf %354, %358 : vector<4x32xf32>
    %cst_72 = arith.constant dense<0.000000e+00> : vector<4x8xf32>
    %360 = tpu.matmul %359, %13, %cst_72 {dimension_numbers = #tpu.dot_dimension_numbers<[1], [0], [0], [1], [0, 0, 1, 1], [], []>} : vector<4x32xf32>, vector<32x8xf32>, vector<4x8xf32> -> vector<4x8xf32>
    %361 = vector.broadcast %14 : vector<1x8xf32> to vector<4x8xf32>
    %362 = arith.addf %360, %361 : vector<4x8xf32>
    %c0_73 = arith.constant 0 : index
    %c0_74 = arith.constant 0 : index
    %c0_75 = arith.constant 0 : index
    %363 = vector.load %arg17[%c0_73, %c0_74, %c0_75] : memref<5x4x8xf32, #tpu.memory_space<vmem>>, vector<1x4x8xf32>
    %364 = vector.shape_cast %363 : vector<1x4x8xf32> to vector<4x8xf32>
    %365 = vector.shape_cast %362 : vector<4x8xf32> to vector<1x4x8xf32>
    tpu.vector_store %arg17[%c0_73, %c0_74, %c0_75], %365 {strides = array<i32>} : memref<5x4x8xf32, #tpu.memory_space<vmem>>, vector<1x4x8xf32>,
    %cst_76 = arith.constant dense<0.000000e+00> : vector<4x128xf32>
    %366 = tpu.matmul %359, %15, %cst_76 {dimension_numbers = #tpu.dot_dimension_numbers<[1], [0], [0], [1], [0, 0, 1, 1], [], []>} : vector<4x32xf32>, vector<32x128xf32>, vector<4x128xf32> -> vector<4x128xf32>
    %367 = vector.broadcast %16 : vector<1x128xf32> to vector<4x128xf32>
    %368 = arith.addf %366, %367 : vector<4x128xf32>
    %369 = vector.extract_strided_slice %22 {offsets = [4, 0], sizes = [4, 128], strides = [1, 1]} : vector<20x128xf32> to vector<4x128xf32>
    %370 = arith.addf %369, %368 : vector<4x128xf32>
    %cst_77 = arith.constant dense<0.000000e+00> : vector<4x128xf32>
    %371 = tpu.matmul %340, %9, %cst_77 {dimension_numbers = #tpu.dot_dimension_numbers<[1], [0], [0], [1], [0, 0, 1, 1], [], []>} : vector<4x32xf32>, vector<32x128xf32>, vector<4x128xf32> -> vector<4x128xf32>
    %372 = arith.addf %370, %371 : vector<4x128xf32>
    %373 = arith.negf %372 : vector<4x128xf32>
    %374 = math.exp %373 : vector<4x128xf32>
    %cst_78 = arith.constant 1.000000e+00 : f32
    %375 = vector.broadcast %cst_78 : f32 to vector<4x128xf32>
    %376 = arith.addf %375, %374 : vector<4x128xf32>
    %377 = arith.divf %375, %376 : vector<4x128xf32>
    %378 = math.tanh %372 : vector<4x128xf32>
    %379 = vector.extract_strided_slice %377 {offsets = [0, 0], sizes = [4, 32], strides = [1, 1]} : vector<4x128xf32> to vector<4x32xf32>
    %380 = vector.extract_strided_slice %377 {offsets = [0, 32], sizes = [4, 32], strides = [1, 1]} : vector<4x128xf32> to vector<4x32xf32>
    %381 = vector.extract_strided_slice %378 {offsets = [0, 64], sizes = [4, 32], strides = [1, 1]} : vector<4x128xf32> to vector<4x32xf32>
    %382 = vector.extract_strided_slice %377 {offsets = [0, 96], sizes = [4, 32], strides = [1, 1]} : vector<4x128xf32> to vector<4x32xf32>
    %383 = arith.mulf %380, %338 : vector<4x32xf32>
    %384 = arith.mulf %379, %381 : vector<4x32xf32>
    %385 = arith.addf %383, %384 : vector<4x32xf32>
    %386 = math.tanh %385 : vector<4x32xf32>
    %387 = arith.mulf %382, %386 : vector<4x32xf32>
    %388 = tpu.concatenate %387, %359 in 1 : vector<4x32xf32>, vector<4x32xf32> -> vector<4x64xf32>
    %cst_79 = arith.constant dense<0.000000e+00> : vector<4x128xf32>
    %389 = tpu.matmul %388, %11, %cst_79 {dimension_numbers = #tpu.dot_dimension_numbers<[1], [0], [0], [1], [0, 0, 1, 1], [], []>} : vector<4x64xf32>, vector<64x128xf32>, vector<4x128xf32> -> vector<4x128xf32>
    %390 = vector.broadcast %12 : vector<1x128xf32> to vector<4x128xf32>
    %391 = arith.addf %389, %390 : vector<4x128xf32>
    %392 = arith.negf %391 : vector<4x128xf32>
    %393 = math.exp %392 : vector<4x128xf32>
    %cst_80 = arith.constant 1.000000e+00 : f32
    %394 = vector.broadcast %cst_80 : f32 to vector<4x128xf32>
    %395 = arith.addf %394, %393 : vector<4x128xf32>
    %396 = arith.divf %394, %395 : vector<4x128xf32>
    %397 = math.tanh %391 : vector<4x128xf32>
    %398 = vector.extract_strided_slice %396 {offsets = [0, 0], sizes = [4, 32], strides = [1, 1]} : vector<4x128xf32> to vector<4x32xf32>
    %399 = vector.extract_strided_slice %396 {offsets = [0, 32], sizes = [4, 32], strides = [1, 1]} : vector<4x128xf32> to vector<4x32xf32>
    %400 = vector.extract_strided_slice %397 {offsets = [0, 64], sizes = [4, 32], strides = [1, 1]} : vector<4x128xf32> to vector<4x32xf32>
    %401 = vector.extract_strided_slice %396 {offsets = [0, 96], sizes = [4, 32], strides = [1, 1]} : vector<4x128xf32> to vector<4x32xf32>
    %402 = arith.mulf %399, %357 : vector<4x32xf32>
    %403 = arith.mulf %398, %400 : vector<4x32xf32>
    %404 = arith.addf %402, %403 : vector<4x32xf32>
    %405 = math.tanh %404 : vector<4x32xf32>
    %406 = arith.mulf %401, %405 : vector<4x32xf32>
    %cst_81 = arith.constant dense<0.000000e+00> : vector<4x8xf32>
    %407 = tpu.matmul %406, %13, %cst_81 {dimension_numbers = #tpu.dot_dimension_numbers<[1], [0], [0], [1], [0, 0, 1, 1], [], []>} : vector<4x32xf32>, vector<32x8xf32>, vector<4x8xf32> -> vector<4x8xf32>
    %408 = vector.broadcast %14 : vector<1x8xf32> to vector<4x8xf32>
    %409 = arith.addf %407, %408 : vector<4x8xf32>
    %c1 = arith.constant 1 : index
    %c0_82 = arith.constant 0 : index
    %c0_83 = arith.constant 0 : index
    %410 = vector.load %arg17[%c1, %c0_82, %c0_83] : memref<5x4x8xf32, #tpu.memory_space<vmem>>, vector<1x4x8xf32>
    %411 = vector.shape_cast %410 : vector<1x4x8xf32> to vector<4x8xf32>
    %412 = vector.shape_cast %409 : vector<4x8xf32> to vector<1x4x8xf32>
    tpu.vector_store %arg17[%c1, %c0_82, %c0_83], %412 {strides = array<i32>} : memref<5x4x8xf32, #tpu.memory_space<vmem>>, vector<1x4x8xf32>,
    %cst_84 = arith.constant dense<0.000000e+00> : vector<4x128xf32>
    %413 = tpu.matmul %406, %15, %cst_84 {dimension_numbers = #tpu.dot_dimension_numbers<[1], [0], [0], [1], [0, 0, 1, 1], [], []>} : vector<4x32xf32>, vector<32x128xf32>, vector<4x128xf32> -> vector<4x128xf32>
    %414 = vector.broadcast %16 : vector<1x128xf32> to vector<4x128xf32>
    %415 = arith.addf %413, %414 : vector<4x128xf32>
    %416 = vector.extract_strided_slice %22 {offsets = [8, 0], sizes = [4, 128], strides = [1, 1]} : vector<20x128xf32> to vector<4x128xf32>
    %417 = arith.addf %416, %415 : vector<4x128xf32>
    %cst_85 = arith.constant dense<0.000000e+00> : vector<4x128xf32>
    %418 = tpu.matmul %387, %9, %cst_85 {dimension_numbers = #tpu.dot_dimension_numbers<[1], [0], [0], [1], [0, 0, 1, 1], [], []>} : vector<4x32xf32>, vector<32x128xf32>, vector<4x128xf32> -> vector<4x128xf32>
    %419 = arith.addf %417, %418 : vector<4x128xf32>
    %420 = arith.negf %419 : vector<4x128xf32>
    %421 = math.exp %420 : vector<4x128xf32>
    %cst_86 = arith.constant 1.000000e+00 : f32
    %422 = vector.broadcast %cst_86 : f32 to vector<4x128xf32>
    %423 = arith.addf %422, %421 : vector<4x128xf32>
    %424 = arith.divf %422, %423 : vector<4x128xf32>
    %425 = math.tanh %419 : vector<4x128xf32>
    %426 = vector.extract_strided_slice %424 {offsets = [0, 0], sizes = [4, 32], strides = [1, 1]} : vector<4x128xf32> to vector<4x32xf32>
    %427 = vector.extract_strided_slice %424 {offsets = [0, 32], sizes = [4, 32], strides = [1, 1]} : vector<4x128xf32> to vector<4x32xf32>
    %428 = vector.extract_strided_slice %425 {offsets = [0, 64], sizes = [4, 32], strides = [1, 1]} : vector<4x128xf32> to vector<4x32xf32>
    %429 = vector.extract_strided_slice %424 {offsets = [0, 96], sizes = [4, 32], strides = [1, 1]} : vector<4x128xf32> to vector<4x32xf32>
    %430 = arith.mulf %427, %385 : vector<4x32xf32>
    %431 = arith.mulf %426, %428 : vector<4x32xf32>
    %432 = arith.addf %430, %431 : vector<4x32xf32>
    %433 = math.tanh %432 : vector<4x32xf32>
    %434 = arith.mulf %429, %433 : vector<4x32xf32>
    %435 = tpu.concatenate %434, %406 in 1 : vector<4x32xf32>, vector<4x32xf32> -> vector<4x64xf32>
    %cst_87 = arith.constant dense<0.000000e+00> : vector<4x128xf32>
    %436 = tpu.matmul %435, %11, %cst_87 {dimension_numbers = #tpu.dot_dimension_numbers<[1], [0], [0], [1], [0, 0, 1, 1], [], []>} : vector<4x64xf32>, vector<64x128xf32>, vector<4x128xf32> -> vector<4x128xf32>
    %437 = vector.broadcast %12 : vector<1x128xf32> to vector<4x128xf32>
    %438 = arith.addf %436, %437 : vector<4x128xf32>
    %439 = arith.negf %438 : vector<4x128xf32>
    %440 = math.exp %439 : vector<4x128xf32>
    %cst_88 = arith.constant 1.000000e+00 : f32
    %441 = vector.broadcast %cst_88 : f32 to vector<4x128xf32>
    %442 = arith.addf %441, %440 : vector<4x128xf32>
    %443 = arith.divf %441, %442 : vector<4x128xf32>
    %444 = math.tanh %438 : vector<4x128xf32>
    %445 = vector.extract_strided_slice %443 {offsets = [0, 0], sizes = [4, 32], strides = [1, 1]} : vector<4x128xf32> to vector<4x32xf32>
    %446 = vector.extract_strided_slice %443 {offsets = [0, 32], sizes = [4, 32], strides = [1, 1]} : vector<4x128xf32> to vector<4x32xf32>
    %447 = vector.extract_strided_slice %444 {offsets = [0, 64], sizes = [4, 32], strides = [1, 1]} : vector<4x128xf32> to vector<4x32xf32>
    %448 = vector.extract_strided_slice %443 {offsets = [0, 96], sizes = [4, 32], strides = [1, 1]} : vector<4x128xf32> to vector<4x32xf32>
    %449 = arith.mulf %446, %404 : vector<4x32xf32>
    %450 = arith.mulf %445, %447 : vector<4x32xf32>
    %451 = arith.addf %449, %450 : vector<4x32xf32>
    %452 = math.tanh %451 : vector<4x32xf32>
    %453 = arith.mulf %448, %452 : vector<4x32xf32>
    %cst_89 = arith.constant dense<0.000000e+00> : vector<4x8xf32>
    %454 = tpu.matmul %453, %13, %cst_89 {dimension_numbers = #tpu.dot_dimension_numbers<[1], [0], [0], [1], [0, 0, 1, 1], [], []>} : vector<4x32xf32>, vector<32x8xf32>, vector<4x8xf32> -> vector<4x8xf32>
    %455 = vector.broadcast %14 : vector<1x8xf32> to vector<4x8xf32>
    %456 = arith.addf %454, %455 : vector<4x8xf32>
    %c2 = arith.constant 2 : index
    %c0_90 = arith.constant 0 : index
    %c0_91 = arith.constant 0 : index
    %457 = vector.load %arg17[%c2, %c0_90, %c0_91] : memref<5x4x8xf32, #tpu.memory_space<vmem>>, vector<1x4x8xf32>
    %458 = vector.shape_cast %457 : vector<1x4x8xf32> to vector<4x8xf32>
    %459 = vector.shape_cast %456 : vector<4x8xf32> to vector<1x4x8xf32>
    tpu.vector_store %arg17[%c2, %c0_90, %c0_91], %459 {strides = array<i32>} : memref<5x4x8xf32, #tpu.memory_space<vmem>>, vector<1x4x8xf32>,
    %cst_92 = arith.constant dense<0.000000e+00> : vector<4x128xf32>
    %460 = tpu.matmul %453, %15, %cst_92 {dimension_numbers = #tpu.dot_dimension_numbers<[1], [0], [0], [1], [0, 0, 1, 1], [], []>} : vector<4x32xf32>, vector<32x128xf32>, vector<4x128xf32> -> vector<4x128xf32>
    %461 = vector.broadcast %16 : vector<1x128xf32> to vector<4x128xf32>
    %462 = arith.addf %460, %461 : vector<4x128xf32>
    %463 = vector.extract_strided_slice %22 {offsets = [12, 0], sizes = [4, 128], strides = [1, 1]} : vector<20x128xf32> to vector<4x128xf32>
    %464 = arith.addf %463, %462 : vector<4x128xf32>
    %cst_93 = arith.constant dense<0.000000e+00> : vector<4x128xf32>
    %465 = tpu.matmul %434, %9, %cst_93 {dimension_numbers = #tpu.dot_dimension_numbers<[1], [0], [0], [1], [0, 0, 1, 1], [], []>} : vector<4x32xf32>, vector<32x128xf32>, vector<4x128xf32> -> vector<4x128xf32>
    %466 = arith.addf %464, %465 : vector<4x128xf32>
    %467 = arith.negf %466 : vector<4x128xf32>
    %468 = math.exp %467 : vector<4x128xf32>
    %cst_94 = arith.constant 1.000000e+00 : f32
    %469 = vector.broadcast %cst_94 : f32 to vector<4x128xf32>
    %470 = arith.addf %469, %468 : vector<4x128xf32>
    %471 = arith.divf %469, %470 : vector<4x128xf32>
    %472 = math.tanh %466 : vector<4x128xf32>
    %473 = vector.extract_strided_slice %471 {offsets = [0, 0], sizes = [4, 32], strides = [1, 1]} : vector<4x128xf32> to vector<4x32xf32>
    %474 = vector.extract_strided_slice %471 {offsets = [0, 32], sizes = [4, 32], strides = [1, 1]} : vector<4x128xf32> to vector<4x32xf32>
    %475 = vector.extract_strided_slice %472 {offsets = [0, 64], sizes = [4, 32], strides = [1, 1]} : vector<4x128xf32> to vector<4x32xf32>
    %476 = vector.extract_strided_slice %471 {offsets = [0, 96], sizes = [4, 32], strides = [1, 1]} : vector<4x128xf32> to vector<4x32xf32>
    %477 = arith.mulf %474, %432 : vector<4x32xf32>
    %478 = arith.mulf %473, %475 : vector<4x32xf32>
    %479 = arith.addf %477, %478 : vector<4x32xf32>
    %480 = math.tanh %479 : vector<4x32xf32>
    %481 = arith.mulf %476, %480 : vector<4x32xf32>
    %482 = tpu.concatenate %481, %453 in 1 : vector<4x32xf32>, vector<4x32xf32> -> vector<4x64xf32>
    %cst_95 = arith.constant dense<0.000000e+00> : vector<4x128xf32>
    %483 = tpu.matmul %482, %11, %cst_95 {dimension_numbers = #tpu.dot_dimension_numbers<[1], [0], [0], [1], [0, 0, 1, 1], [], []>} : vector<4x64xf32>, vector<64x128xf32>, vector<4x128xf32> -> vector<4x128xf32>
    %484 = vector.broadcast %12 : vector<1x128xf32> to vector<4x128xf32>
    %485 = arith.addf %483, %484 : vector<4x128xf32>
    %486 = arith.negf %485 : vector<4x128xf32>
    %487 = math.exp %486 : vector<4x128xf32>
    %cst_96 = arith.constant 1.000000e+00 : f32
    %488 = vector.broadcast %cst_96 : f32 to vector<4x128xf32>
    %489 = arith.addf %488, %487 : vector<4x128xf32>
    %490 = arith.divf %488, %489 : vector<4x128xf32>
    %491 = math.tanh %485 : vector<4x128xf32>
    %492 = vector.extract_strided_slice %490 {offsets = [0, 0], sizes = [4, 32], strides = [1, 1]} : vector<4x128xf32> to vector<4x32xf32>
    %493 = vector.extract_strided_slice %490 {offsets = [0, 32], sizes = [4, 32], strides = [1, 1]} : vector<4x128xf32> to vector<4x32xf32>
    %494 = vector.extract_strided_slice %491 {offsets = [0, 64], sizes = [4, 32], strides = [1, 1]} : vector<4x128xf32> to vector<4x32xf32>
    %495 = vector.extract_strided_slice %490 {offsets = [0, 96], sizes = [4, 32], strides = [1, 1]} : vector<4x128xf32> to vector<4x32xf32>
    %496 = arith.mulf %493, %451 : vector<4x32xf32>
    %497 = arith.mulf %492, %494 : vector<4x32xf32>
    %498 = arith.addf %496, %497 : vector<4x32xf32>
    %499 = math.tanh %498 : vector<4x32xf32>
    %500 = arith.mulf %495, %499 : vector<4x32xf32>
    %cst_97 = arith.constant dense<0.000000e+00> : vector<4x8xf32>
    %501 = tpu.matmul %500, %13, %cst_97 {dimension_numbers = #tpu.dot_dimension_numbers<[1], [0], [0], [1], [0, 0, 1, 1], [], []>} : vector<4x32xf32>, vector<32x8xf32>, vector<4x8xf32> -> vector<4x8xf32>
    %502 = vector.broadcast %14 : vector<1x8xf32> to vector<4x8xf32>
    %503 = arith.addf %501, %502 : vector<4x8xf32>
    %c3 = arith.constant 3 : index
    %c0_98 = arith.constant 0 : index
    %c0_99 = arith.constant 0 : index
    %504 = vector.load %arg17[%c3, %c0_98, %c0_99] : memref<5x4x8xf32, #tpu.memory_space<vmem>>, vector<1x4x8xf32>
    %505 = vector.shape_cast %504 : vector<1x4x8xf32> to vector<4x8xf32>
    %506 = vector.shape_cast %503 : vector<4x8xf32> to vector<1x4x8xf32>
    tpu.vector_store %arg17[%c3, %c0_98, %c0_99], %506 {strides = array<i32>} : memref<5x4x8xf32, #tpu.memory_space<vmem>>, vector<1x4x8xf32>,
    %cst_100 = arith.constant dense<0.000000e+00> : vector<4x128xf32>
    %507 = tpu.matmul %500, %15, %cst_100 {dimension_numbers = #tpu.dot_dimension_numbers<[1], [0], [0], [1], [0, 0, 1, 1], [], []>} : vector<4x32xf32>, vector<32x128xf32>, vector<4x128xf32> -> vector<4x128xf32>
    %508 = vector.broadcast %16 : vector<1x128xf32> to vector<4x128xf32>
    %509 = arith.addf %507, %508 : vector<4x128xf32>
    %510 = vector.extract_strided_slice %22 {offsets = [16, 0], sizes = [4, 128], strides = [1, 1]} : vector<20x128xf32> to vector<4x128xf32>
    %511 = arith.addf %510, %509 : vector<4x128xf32>
    %cst_101 = arith.constant dense<0.000000e+00> : vector<4x128xf32>
    %512 = tpu.matmul %481, %9, %cst_101 {dimension_numbers = #tpu.dot_dimension_numbers<[1], [0], [0], [1], [0, 0, 1, 1], [], []>} : vector<4x32xf32>, vector<32x128xf32>, vector<4x128xf32> -> vector<4x128xf32>
    %513 = arith.addf %511, %512 : vector<4x128xf32>
    %514 = arith.negf %513 : vector<4x128xf32>
    %515 = math.exp %514 : vector<4x128xf32>
    %cst_102 = arith.constant 1.000000e+00 : f32
    %516 = vector.broadcast %cst_102 : f32 to vector<4x128xf32>
    %517 = arith.addf %516, %515 : vector<4x128xf32>
    %518 = arith.divf %516, %517 : vector<4x128xf32>
    %519 = math.tanh %513 : vector<4x128xf32>
    %520 = vector.extract_strided_slice %518 {offsets = [0, 0], sizes = [4, 32], strides = [1, 1]} : vector<4x128xf32> to vector<4x32xf32>
    %521 = vector.extract_strided_slice %518 {offsets = [0, 32], sizes = [4, 32], strides = [1, 1]} : vector<4x128xf32> to vector<4x32xf32>
    %522 = vector.extract_strided_slice %519 {offsets = [0, 64], sizes = [4, 32], strides = [1, 1]} : vector<4x128xf32> to vector<4x32xf32>
    %523 = vector.extract_strided_slice %518 {offsets = [0, 96], sizes = [4, 32], strides = [1, 1]} : vector<4x128xf32> to vector<4x32xf32>
    %524 = arith.mulf %521, %479 : vector<4x32xf32>
    %525 = arith.mulf %520, %522 : vector<4x32xf32>
    %526 = arith.addf %524, %525 : vector<4x32xf32>
    %527 = math.tanh %526 : vector<4x32xf32>
    %528 = arith.mulf %523, %527 : vector<4x32xf32>
    %529 = tpu.concatenate %528, %500 in 1 : vector<4x32xf32>, vector<4x32xf32> -> vector<4x64xf32>
    %cst_103 = arith.constant dense<0.000000e+00> : vector<4x128xf32>
    %530 = tpu.matmul %529, %11, %cst_103 {dimension_numbers = #tpu.dot_dimension_numbers<[1], [0], [0], [1], [0, 0, 1, 1], [], []>} : vector<4x64xf32>, vector<64x128xf32>, vector<4x128xf32> -> vector<4x128xf32>
    %531 = vector.broadcast %12 : vector<1x128xf32> to vector<4x128xf32>
    %532 = arith.addf %530, %531 : vector<4x128xf32>
    %533 = arith.negf %532 : vector<4x128xf32>
    %534 = math.exp %533 : vector<4x128xf32>
    %cst_104 = arith.constant 1.000000e+00 : f32
    %535 = vector.broadcast %cst_104 : f32 to vector<4x128xf32>
    %536 = arith.addf %535, %534 : vector<4x128xf32>
    %537 = arith.divf %535, %536 : vector<4x128xf32>
    %538 = math.tanh %532 : vector<4x128xf32>
    %539 = vector.extract_strided_slice %537 {offsets = [0, 0], sizes = [4, 32], strides = [1, 1]} : vector<4x128xf32> to vector<4x32xf32>
    %540 = vector.extract_strided_slice %537 {offsets = [0, 32], sizes = [4, 32], strides = [1, 1]} : vector<4x128xf32> to vector<4x32xf32>
    %541 = vector.extract_strided_slice %538 {offsets = [0, 64], sizes = [4, 32], strides = [1, 1]} : vector<4x128xf32> to vector<4x32xf32>
    %542 = vector.extract_strided_slice %537 {offsets = [0, 96], sizes = [4, 32], strides = [1, 1]} : vector<4x128xf32> to vector<4x32xf32>
    %543 = arith.mulf %540, %498 : vector<4x32xf32>
    %544 = arith.mulf %539, %541 : vector<4x32xf32>
    %545 = arith.addf %543, %544 : vector<4x32xf32>
    %546 = math.tanh %545 : vector<4x32xf32>
    %547 = arith.mulf %542, %546 : vector<4x32xf32>
    %cst_105 = arith.constant dense<0.000000e+00> : vector<4x8xf32>
    %548 = tpu.matmul %547, %13, %cst_105 {dimension_numbers = #tpu.dot_dimension_numbers<[1], [0], [0], [1], [0, 0, 1, 1], [], []>} : vector<4x32xf32>, vector<32x8xf32>, vector<4x8xf32> -> vector<4x8xf32>
    %549 = vector.broadcast %14 : vector<1x8xf32> to vector<4x8xf32>
    %550 = arith.addf %548, %549 : vector<4x8xf32>
    %c4 = arith.constant 4 : index
    %c0_106 = arith.constant 0 : index
    %c0_107 = arith.constant 0 : index
    %551 = vector.load %arg17[%c4, %c0_106, %c0_107] : memref<5x4x8xf32, #tpu.memory_space<vmem>>, vector<1x4x8xf32>
    %552 = vector.shape_cast %551 : vector<1x4x8xf32> to vector<4x8xf32>
    %553 = vector.shape_cast %550 : vector<4x8xf32> to vector<1x4x8xf32>
    tpu.vector_store %arg17[%c4, %c0_106, %c0_107], %553 {strides = array<i32>} : memref<5x4x8xf32, #tpu.memory_space<vmem>>, vector<1x4x8xf32>,
    return
  }
}

</mosaic_0001>

<bundles_post_ra>
// kernel: recurrent_encoder_decoder.1
= control target key start
LH: loop header
LB: loop body
LE: loop exit
PB: predicated region body
PF: predicated region fallthrough
CT: control target
= control target key end

     0   :  { %vm110_vm0 = vcmask 64512   ;;  %v5154_v3 = vmov 0.0   ;;  %vm5155_vm1 = vmmov 0   ;;  %v5156_v10 = vmov 0.0|0.0   ;;  %s5157_s30 = smov 64   ;;  %s6053_s2 = inlined_call_operand.vmem [shape: f32[8,128], index: 2, kind: input, shape index: {}]   ;;  %s6054_s0 = inlined_call_operand.vmem [shape: f32[32,8], index: 0, kind: input, shape index: {}]   ;;  %s6055_s3 = inlined_call_operand.vmem [shape: f32[32,128], index: 3, kind: input, shape index: {}]   ;;  %s6056_s4 = inlined_call_operand.vmem [shape: f32[1,128], index: 4, kind: input, shape index: {}]   ;;  %s6057_s8 = inlined_call_operand.vmem [shape: f32[6,128], index: 8, kind: input, shape index: {}]   ;;  %s6058_s1 = inlined_call_operand.vmem [shape: f32[20,6], index: 1, kind: input, shape index: {}]   ;;  %s6059_s5 = inlined_call_operand.vmem [shape: f32[64,128], index: 5, kind: input, shape index: {}]   ;;  %s6060_s6 = inlined_call_operand.vmem [shape: f32[1,128], index: 6, kind: input, shape index: {}]   ;;  %s6061_s7 = inlined_call_operand.vmem [shape: f32[2,128], index: 7, kind: input, shape index: {}]   ;;  %s6062_s9 = inlined_call_operand.vmem [shape: f32[32,128], index: 9, kind: input, shape index: {}]   ;;  %s6063_s10 = inlined_call_operand.vmem [shape: f32[1,128], index: 10, kind: input, shape index: {}]   ;;  %s6064_s11 = inlined_call_operand.vmem [shape: f32[64,128], index: 11, kind: input, shape index: {}]   ;;  %s6065_s12 = inlined_call_operand.vmem [shape: f32[1,128], index: 12, kind: input, shape index: {}]   ;;  %s6066_s13 = inlined_call_operand.vmem [shape: f32[32,8], index: 13, kind: input, shape index: {}]   ;;  %s6067_s15 = inlined_call_operand.vmem [shape: f32[32,128], index: 15, kind: input, shape index: {}]   ;;  %s6068_s14 = inlined_call_operand.vmem [shape: f32[1,8], index: 14, kind: input, shape index: {}]   ;;  %s6069_s17 = inlined_call_operand.vmem [shape: f32[5,4,8], index: 17, kind: output, shape index: {}]   ;;  %s6070_s16 = inlined_call_operand.vmem [shape: f32[1,128], index: 16, kind: input, shape index: {}]  }
   0x1   :  { %6072 = sst [smem:[#allocation2_spill]] %s6053_s2  ;;  %4134 = vmatprep.subr.mxu1 %v5154_v3  ;;  %4136 = vmatprep.mubr.msk.f32.mxu1 %vm5155_vm1, %v5154_v3  ;;  %v64_v4 = vld [vmem:[%s6055_s3] sm:$0xff]  ;;  %v65_v5 = vld [vmem:[%s6055_s3 + $0x8] sm:$0xff]  ;;  %v66_v8 = vld [vmem:[%s6055_s3 + $0x10] sm:$0xff]  ;;  %vm224_vm2 = vcmask 1045504   ;;  %vm214_vm3 = vcmask 48128  }
   0x2   :  { %6073 = sst [smem:[#allocation3_spill]] %s6054_s0  ;;  %s6074_s26 = sld [smem:[#allocation2_spill]]  ;;  %v5271_v7 = vpack.c.bf16 %v65_v5, %v64_v4  ;;  %v67_v9 = vld [vmem:[%s6055_s3 + $0x18] sm:$0xff]  ;;  %v3808_v13 = vld [vmem:[%s6056_s4] ss:$0 sm:$0xff]  ;;  %v70_v38 = vld [vmem:[%s6059_s5 + $0x8] sm:$0xff] }
   0x3   :  { %s6075_s29 = sld [smem:[#allocation3_spill]]  ;;  %v5286_v12 = vpack.c.bf16 %v67_v9, %v66_v8  ;;  %s5158_s4 = smov 32   ;;  %v79_v35 = vld [vmem:[%s6057_s8] sm:$0x3f]  ;;  %v71_v39 = vld [vmem:[%s6059_s5 + $0x10] sm:$0xff]  ;;  %v72_v40 = vld [vmem:[%s6059_s5 + $0x18] sm:$0xff] }
   0x4   :  { %v60_v36 = vld [vmem:[%s6058_s1] sm:$0xff]  ;;  %4135 = vmatpush3.msk.msra.mxu1 %vm224_vm2, %v79_v35  ;;  %v61_v42 = vld [vmem:[%s6058_s1 + $0x8] sm:$0xff]  ;;  %v5346_v43 = vpack.c.bf16 %v72_v40, %v71_v39  ;;  %v62_v46 = vld [vmem:[%s6058_s1 + $0x10] sm:$0xf]  ;;  %vm308_vm4 = vcmask 261120   ;;  %vm418_vm5 = vcmask 523264  }
   0x5   :  { %v69_v37 = vld [vmem:[%s6059_s5] sm:$0xff]  ;;  %4137 = vmatmul.mubr.msk.f32.vlgmr.msra.gmra.mrb[0].mxu1 %vm214_vm3, %v60_v36  ;;  %4645 = vmatprep.subr.bf16.mxu1 %v5156_v10  ;;  %v74_v45 = vld [vmem:[%s6059_s5 + $0x28] sm:$0xff]  ;;  %v75_v49 = vld [vmem:[%s6059_s5 + $0x30] sm:$0xff]  ;;  %vm1991_vm6 = vcmask 1041408   ;;  %vm1988_vm7 = vcmask 15360   ;;  %vm2362_vm8 = vcmask 60416  }
   0x6   :  { %v5338_v41 = vpack.c.bf16 %v70_v38, %v69_v37  ;;  %4139 = vmatprep.mubr.msk.f32.mxu1 %vm5155_vm1, %v5154_v3  ;;  %v73_v44 = vld [vmem:[%s6059_s5 + $0x20] sm:$0xff]  ;;  %v76_v50 = vld [vmem:[%s6059_s5 + $0x38] sm:$0xff] }
   0x7   :  { %v5362_v47 = vpack.c.bf16 %v74_v45, %v73_v44  ;;  %v5376_v51 = vpack.c.bf16 %v76_v50, %v75_v49  ;;  %v5408_v60 = vld [vmem:[%s6060_s6] ss:$0 sm:$0xff] }
   0x8   :  { %v63_v0 = vld [vmem:[%s6074_s26] sm:$0xff]  ;;  %4647 = vmatpush3.bf16.msra.mxu1 %v5338_v41 }
   0x9   :  { %v56_v1 = vld [vmem:[%s6075_s29] sm:$0xff]  ;;  %v57_v2 = vld [vmem:[%s6075_s29 + $0x8] sm:$0xff]  ;;  %4126 = vmatprep.subr.mxu0 %v63_v0  ;;  %v58_v6 = vld [vmem:[%s6075_s29 + $0x10] sm:$0xff]  ;;  %4648 = vmatprep.subr.bf16.mxu1 %v5156_v10 }
   0xa   :  { %4128 = vmatprep.mubr.msk.f32.mxu0 %vm110_vm0, %v56_v1  ;;  %4127 = vmatpush3.msra.mxu0 %v63_v0  ;;  %v59_v11 = vld [vmem:[%s6075_s29 + $0x18] sm:$0xff] }
   0xb   :  { %4129 = vmatmul.mubr.msk.f32.vlgmr.msra.gmra.mrb[0].mxu0 %vm110_vm0, %v57_v2  ;;  %4639 = vmatprep.subr.bf16.mxu0 %v5156_v10 }
   0xc   :  { %4641 = vmatpush3.bf16.msra.mxu0 %v5271_v7  ;;  %4131 = vmatprep.mubr.msk.f32.mxu0 %vm110_vm0, %v58_v6 }
   0xd   :  { %4642 = vmatprep.subr.bf16.mxu0 %v5156_v10  ;;  %4140 = vmatmul.mubr.msk.f32.gmra.mrb[2].mxu1 %vm214_vm3, %v61_v42 }
   0xe   :  { %4142 = vmatprep.mubr.msk.f32.mxu1 %vm5155_vm1, %v5154_v3  ;;  %4650 = vmatpush3.bf16.msra.mxu1 %v5346_v43 }
   0xf   :  { %4132 = vmatmul.mubr.msk.f32.gmra.mrb[2].mxu0 %vm110_vm0, %v59_v11  ;;  %4651 = vmatprep.subr.bf16.mxu1 %v5156_v10 }
  0x10   :  { %4644 = vmatpush3.bf16.msra.mxu0 %v5286_v12  ;;  %4153 = vmatprep.mubr.msk.f32.mxu0 %vm5155_vm1, %v5154_v3 }
  0x11   :  { %4657 = vmatprep.subr.bf16.mxu0 %v5156_v10  ;;  %4143 = vmatmul.mubr.msk.f32.gmra.mrb[4].mxu1 %vm214_vm3, %v62_v46 }
  0x12   :  { %4172 = vmatprep.mubr.msk.f32.mxu1 %vm5155_vm1, %v5154_v3  ;;  %4653 = vmatpush3.bf16.msra.mxu1 %v5362_v47 }
  0x13   :  { %4154 = vmatmul.mubr.f32.vlgmr.msra.gmra.mrb[4].mxu0 %v5154_v3  ;;  %4654 = vmatprep.subr.bf16.mxu1 %v5156_v10 }
  0x14   :  { %4659 = vmatpush3.bf16.msra.mxu0 %v5271_v7  ;;  %4183 = vmatprep.mubr.msk.f32.mxu0 %vm5155_vm1, %v5154_v3 }
  0x15   :  { %4660 = vmatprep.subr.bf16.mxu0 %v5156_v10 }
  0x16   :  { %4656 = vmatpush3.bf16.msra.mxu1 %v5376_v51 }
  0x17   :  { %4675 = vmatprep.subr.bf16.mxu1 %v5156_v10 }
  0x18   :  { %4662 = vmatpush3.bf16.msra.mxu0 %v5286_v12 }
  0x19   :  { %4663 = vmatprep.subr.bf16.mxu0 %v5156_v10 }
  0xd8   :  { %v5382_v54 = vpop.f32.mrb[0].mxu1 }
  0xd9   :  { %v4138_v55 = vpop.f32.mrb[1].mxu1 }
  0xde   :  { %v4130_v14 = vpop.f32.mrb[0].mxu0 }
  0xdf   :  { %v5304_v15 = vadd.f32 %v4130_v14, %v3808_v13  ;;  %v189_v16 = vpop.f32.mrb[1].mxu0 }
  0xe0   :  { %v5310_v21 = vadd.f32 %v3808_v13, %v189_v16  ;;  %v5384_v56 = vpop.f32.mrb[2].mxu1 }
  0xe1   :  { %v4141_v57 = vpop.f32.mrb[3].mxu1 }
  0xe2   :  { %v4133_v17 = vpop.f32.mrb[2].mxu0 }
  0xe3   :  { %v5306_v18 = vadd.f32 %v4133_v17, %v3808_v13  ;;  %v199_v19 = vpop.f32.mrb[3].mxu0 }
  0xe4   :  { %v5308_v20 = vadd.f32 %v3808_v13, %v199_v19 }
  0xe6   :  { %v378_v22 = vpop.f32.mrb[4].mxu0 }
  0xe7   :  { %v382_v23 = vadd.f32 %v378_v22, %v5310_v21  ;;  %v4155_v24 = vpop.f32.mrb[5].mxu0 }
  0xe9   :  { %4945 = vtanh.f32 %v382_v23  ;;  %v3818_v26 = vmul.f32 -1.442695, %v382_v23 }
  0xeb   :  { %4947 = vpow2.f32 %v3818_v26 }
  0xf3   :  { %v4946_v25 = vpop.eup %4945 }
  0xf4   :  { %392 = vrot.lane.b32.xlu0 %v4946_v25, %s5157_s30 }
  0xf5   :  { %v4948_v27 = vpop.eup %4947 }
  0xf6   :  { %v386_v28 = vadd.f32 1.0, %v4948_v27 }
  0xf8   :  { %4949 = vrcp.f32 %v386_v28 }
 0x102   :  { %v4950_v29 = vpop.eup %4949 }
 0x103   :  { %v390_v32 = vmul.f32 0.0, %v4950_v29 }
 0x166   :  { %v393_v30 = vpop.permute.xlu0 %392 }
 0x167   :  { %v395_v31 = vmul.f32 %v4950_v29, %v393_v30 }
 0x169   :  { %397 = vrot.lane.b32.xlu0 %v395_v31, %s5158_s4 }
 0x1db   :  { %v398_v33 = vpop.permute.xlu0 %397 }
 0x1dc   :  { %v5315_v34 = vadd.f32 %v398_v33, %v390_v32 }
 0x1de   :  { %4951 = vtanh.f32 %v5315_v34  ;;  %v600_v25 = vrot.slane %v5315_v34, 4 }
 0x1e8   :  { %v4952_v48 = vpop.eup %4951 }
 0x1e9   :  { %403 = vrot.lane.b32.xlu1 %v4952_v48, %s5157_s30 }
 0x25b   :  { %v404_v52 = vpop.permute.xlu1 %403 }
 0x25c   :  { %v406_v53 = vmul.f32 %v4950_v29, %v404_v52 }
 0x25e   :  { %408 = vrot.lane.b32.xlu1 %v406_v53, %s5158_s4 }
 0x2d0   :  { %v409_v58 = vpop.permute.xlu1 %408 }
 0x2d1   :  { %v411_v59 = vsel %vm308_vm4, %v409_v58, 0.0  ;;  %4184 = vmatmul.mubr.msk.f32.vlgmr.msra.gmra.mrb[6].mxu0 %vm308_vm4, %v409_v58 }
 0x2d2   :  { %4173 = vmatmul.mubr.msk.f32.vlgmr.msra.gmra.mrb[6].mxu1 %vm418_vm5, %v411_v59  ;;  %4665 = vmatpush3.bf16.msra.mxu0 %v5338_v41 }
 0x2d3   :  { %4666 = vmatprep.subr.bf16.mxu0 %v5156_v10  ;;  %4677 = vmatpush3.bf16.msra.mxu1 %v5271_v7 }
 0x2d4   :  { %4678 = vmatprep.subr.bf16.mxu1 %v5156_v10  ;;  %4202 = vmatprep.mubr.msk.f32.mxu0 %vm5155_vm1, %v5154_v3 }
 0x2d5   :  { %4213 = vmatprep.mubr.msk.f32.mxu1 %vm5155_vm1, %v5154_v3 }
 0x2d6   :  { %4668 = vmatpush3.bf16.msra.mxu0 %v5346_v43 }
 0x2d7   :  { %4669 = vmatprep.subr.bf16.mxu0 %v5156_v10  ;;  %4680 = vmatpush3.bf16.msra.mxu1 %v5286_v12 }
 0x2d8   :  { %4681 = vmatprep.subr.bf16.mxu1 %v5156_v10 }
 0x2da   :  { %4671 = vmatpush3.bf16.msra.mxu0 %v5362_v47 }
 0x2db   :  { %4672 = vmatprep.subr.bf16.mxu0 %v5156_v10 }
 0x2de   :  { %4674 = vmatpush3.bf16.msra.mxu0 %v5376_v51 }
 0x2df   :  { %4693 = vmatprep.subr.bf16.mxu0 %v5156_v10 }
 0x3a4   :  { %v584_v61 = vpop.f32.mrb[6].mxu0 }
 0x3a5   :  { %v589_v62 = vrot.slane %v584_v61, 4  ;;  %v488_v63 = vpop.f32.mrb[6].mxu1  ;;  %v4185_v0 = vpop.f32.mrb[7].mxu0 }
 0x3a6   :  { %v489_v1 = vadd.f32 %v5408_v60, %v488_v63  ;;  %v4174_v2 = vpop.f32.mrb[7].mxu1 }
 0x3a7   :  { %v591_v4 = vadd.f32 %v589_v62, %v5310_v21 }
 0x3a8   :  { %4953 = vtanh.f32 %v489_v1  ;;  %v3821_v8 = vmul.f32 -1.442695, %v489_v1 }
 0x3a9   :  { %4955 = vtanh.f32 %v591_v4  ;;  %v3823_v9 = vmul.f32 -1.442695, %v591_v4 }
 0x3aa   :  { %4957 = vpow2.f32 %v3821_v8 }
 0x3ab   :  { %4959 = vpow2.f32 %v3823_v9 }
 0x3b2   :  { %v4954_v5 = vpop.eup %4953 }
 0x3b3   :  { %v4956_v6 = vpop.eup %4955  ;;  %501 = vrot.lane.b32.xlu0 %v4954_v5, %s5157_s30 }
 0x3b4   :  { %604 = vrot.lane.b32.xlu1 %v4956_v6, %s5157_s30  ;;  %v4958_v11 = vpop.eup %4957 }
 0x3b5   :  { %v4960_v13 = vpop.eup %4959  ;;  %v495_v14 = vadd.f32 1.0, %v4958_v11 }
 0x3b6   :  { %v595_v16 = vadd.f32 1.0, %v4960_v13 }
 0x3b7   :  { %4961 = vrcp.f32 %v495_v14 }
 0x3b8   :  { %4963 = vrcp.f32 %v595_v16 }
 0x3c1   :  { %v4962_v17 = vpop.eup %4961 }
 0x3c2   :  { %v4964_v21 = vpop.eup %4963  ;;  %v499_v26 = vmul.f32 0.0, %v4962_v17 }
 0x3c3   :  { %v602_v28 = vmul.f32 %v4964_v21, %v600_v25 }
 0x425   :  { %v502_v19 = vpop.permute.xlu0 %501 }
 0x426   :  { %v504_v22 = vmul.f32 %v4962_v17, %v502_v19  ;;  %v605_v23 = vpop.permute.xlu1 %604 }
 0x427   :  { %v607_v24 = vmul.f32 %v4964_v21, %v605_v23 }
 0x428   :  { %506 = vrot.lane.b32.xlu0 %v504_v22, %s5158_s4 }
 0x429   :  { %609 = vrot.lane.b32.xlu1 %v607_v24, %s5158_s4 }
 0x49a   :  { %v507_v27 = vpop.permute.xlu0 %506 }
 0x49b   :  { %v5417_v29 = vadd.f32 %v507_v27, %v499_v26  ;;  %v610_v30 = vpop.permute.xlu1 %609 }
 0x49c   :  { %v5419_v31 = vadd.f32 %v610_v30, %v602_v28 }
 0x49d   :  { %4965 = vtanh.f32 %v5417_v29 }
 0x49e   :  { %4967 = vtanh.f32 %v5419_v31  ;;  %v811_v11 = vrot.slane %v5419_v31, 4 }
 0x4a7   :  { %v4966_v32 = vpop.eup %4965 }
 0x4a8   :  { %v4968_v33 = vpop.eup %4967  ;;  %512 = vrot.lane.b32.xlu0 %v4966_v32, %s5157_s30 }
 0x4a9   :  { %615 = vrot.lane.b32.xlu1 %v4968_v33, %s5157_s30 }
 0x51a   :  { %v513_v35 = vpop.permute.xlu0 %512 }
 0x51b   :  { %v515_v34 = vmul.f32 %v4962_v17, %v513_v35  ;;  %v616_v36 = vpop.permute.xlu1 %615 }
 0x51c   :  { %v618_v37 = vmul.f32 %v4964_v21, %v616_v36 }
 0x51d   :  { %v624_v38 = vrot.slane %v515_v34, 4 }
 0x51e   :  { %620 = vrot.lane.b32.xlu0 %v618_v37, %s5158_s4  ;;  %v727_v39 = vrot.slane %v618_v37, 4 }
 0x51f   :  { %625 = vrot.lane.b32.xlu1 %v624_v38, %s5157_s30 }
 0x522   :  { %728 = vrot.lane.b32.xlu0 %v727_v39, %s5158_s4 }
 0x590   :  { %v621_v40 = vpop.permute.xlu0 %620 }
 0x591   :  { %v626_v42 = vpop.permute.xlu1 %625 }
 0x592   :  { %v628_v44 = vsel %vm308_vm4, %v621_v40, %v626_v42 }
 0x593   :  { %v630_v45 = vrot.slane %v628_v44, 4 }
 0x594   :  { %v729_v46 = vpop.permute.xlu0 %728 }
 0x595   :  { %4203 = vmatmul.mubr.msk.f32.vlgmr.msra.gmra.mrb[8].mxu0 %vm418_vm5, %v630_v45  ;;  %4214 = vmatmul.mubr.msk.f32.vlgmr.msra.gmra.mrb[8].mxu1 %vm308_vm4, %v729_v46 }
 0x596   :  { %4683 = vmatpush3.bf16.msra.mxu1 %v5338_v41  ;;  %4695 = vmatpush3.bf16.msra.mxu0 %v5271_v7 }
 0x597   :  { %4684 = vmatprep.subr.bf16.mxu1 %v5156_v10  ;;  %4696 = vmatprep.subr.bf16.mxu0 %v5156_v10 }
 0x598   :  { %4243 = vmatprep.mubr.msk.f32.mxu0 %vm5155_vm1, %v5154_v3  ;;  %4232 = vmatprep.mubr.msk.f32.mxu1 %vm5155_vm1, %v5154_v3 }
 0x59a   :  { %4686 = vmatpush3.bf16.msra.mxu1 %v5346_v43  ;;  %4698 = vmatpush3.bf16.msra.mxu0 %v5286_v12 }
 0x59b   :  { %4687 = vmatprep.subr.bf16.mxu1 %v5156_v10  ;;  %4699 = vmatprep.subr.bf16.mxu0 %v5156_v10 }
 0x59e   :  { %4689 = vmatpush3.bf16.msra.mxu1 %v5362_v47 }
 0x59f   :  { %4690 = vmatprep.subr.bf16.mxu1 %v5156_v10 }
 0x5a2   :  { %4692 = vmatpush3.bf16.msra.mxu1 %v5376_v51 }
 0x5a3   :  { %4711 = vmatprep.subr.bf16.mxu1 %v5156_v10 }
 0x668   :  { %v699_v48 = vpop.f32.mrb[8].mxu0  ;;  %v798_v49 = vpop.f32.mrb[8].mxu1 }
 0x669   :  { %v700_v50 = vadd.f32 %v5408_v60, %v699_v48  ;;  %v802_v52 = vadd.f32 %v798_v49, %v5304_v15  ;;  %v4204_v53 = vpop.f32.mrb[9].mxu0  ;;  %v4215_v55 = vpop.f32.mrb[9].mxu1 }
 0x66b   :  { %4969 = vtanh.f32 %v700_v50  ;;  %v3825_v59 = vmul.f32 -1.442695, %v700_v50  ;;  %v3827_v61 = vmul.f32 -1.442695, %v802_v52 }
 0x66c   :  { %4971 = vtanh.f32 %v802_v52 }
 0x66d   :  { %4973 = vpow2.f32 %v3825_v59 }
 0x66e   :  { %4975 = vpow2.f32 %v3827_v61 }
 0x675   :  { %v4970_v57 = vpop.eup %4969 }
 0x676   :  { %v4972_v58 = vpop.eup %4971  ;;  %712 = vrot.lane.b32.xlu1 %v4970_v57, %s5157_s30 }
 0x677   :  { %815 = vrot.lane.b32.xlu0 %v4972_v58, %s5157_s30  ;;  %v4974_v62 = vpop.eup %4973 }
 0x678   :  { %v4976_v63 = vpop.eup %4975  ;;  %v706_v0 = vadd.f32 1.0, %v4974_v62 }
 0x679   :  { %v806_v1 = vadd.f32 1.0, %v4976_v63 }
 0x67a   :  { %4977 = vrcp.f32 %v706_v0 }
 0x67b   :  { %4979 = vrcp.f32 %v806_v1 }
 0x684   :  { %v4978_v2 = vpop.eup %4977 }
 0x685   :  { %v4980_v5 = vpop.eup %4979  ;;  %v710_v13 = vmul.f32 %v4978_v2, %v5417_v29 }
 0x686   :  { %v813_v16 = vmul.f32 %v4980_v5, %v811_v11 }
 0x6e8   :  { %v713_v4 = vpop.permute.xlu1 %712 }
 0x6e9   :  { %v715_v6 = vmul.f32 %v4978_v2, %v713_v4  ;;  %v816_v8 = vpop.permute.xlu0 %815 }
 0x6ea   :  { %v818_v9 = vmul.f32 %v4980_v5, %v816_v8 }
 0x6eb   :  { %717 = vrot.lane.b32.xlu1 %v715_v6, %s5158_s4 }
 0x6ec   :  { %820 = vrot.lane.b32.xlu0 %v818_v9, %s5158_s4 }
 0x75d   :  { %v718_v14 = vpop.permute.xlu1 %717 }
 0x75e   :  { %v5455_v17 = vadd.f32 %v718_v14, %v710_v13  ;;  %v821_v19 = vpop.permute.xlu0 %820 }
 0x75f   :  { %v5457_v21 = vadd.f32 %v821_v19, %v813_v16 }
 0x760   :  { %4981 = vtanh.f32 %v5455_v17 }
 0x761   :  { %4983 = vtanh.f32 %v5457_v21  ;;  %v1020_v57 = vrot.slane %v5457_v21, 4 }
 0x76a   :  { %v4982_v22 = vpop.eup %4981 }
 0x76b   :  { %v4984_v23 = vpop.eup %4983  ;;  %723 = vrot.lane.b32.xlu1 %v4982_v22, %s5157_s30 }
 0x76c   :  { %826 = vrot.lane.b32.xlu0 %v4984_v23, %s5157_s30 }
 0x7dd   :  { %v724_v24 = vpop.permute.xlu1 %723 }
 0x7de   :  { %v726_v25 = vmul.f32 %v4978_v2, %v724_v24  ;;  %v827_v26 = vpop.permute.xlu0 %826 }
 0x7df   :  { %v829_v27 = vmul.f32 %v4980_v5, %v827_v26 }
 0x7e0   :  { %835 = vrot.lane.b32.xlu0 %v726_v25, %s5157_s30 }
 0x7e1   :  { %831 = vrot.lane.b32.xlu1 %v829_v27, %s5158_s4 }
 0x852   :  { %v836_v28 = vpop.permute.xlu0 %835 }
 0x853   :  { %v832_v29 = vpop.permute.xlu1 %831 }
 0x854   :  { %v838_v30 = vsel %vm308_vm4, %v832_v29, %v836_v28  ;;  %4244 = vmatmul.mubr.msk.f32.vlgmr.msra.gmra.mrb[10].mxu0 %vm308_vm4, %v832_v29 }
 0x855   :  { %4233 = vmatmul.mubr.msk.f32.vlgmr.msra.gmra.mrb[10].mxu1 %vm418_vm5, %v838_v30  ;;  %4701 = vmatpush3.bf16.msra.mxu0 %v5338_v41 }
 0x856   :  { %4702 = vmatprep.subr.bf16.mxu0 %v5156_v10  ;;  %4713 = vmatpush3.bf16.msra.mxu1 %v5271_v7 }
 0x857   :  { %4714 = vmatprep.subr.bf16.mxu1 %v5156_v10  ;;  %4262 = vmatprep.mubr.msk.f32.mxu0 %vm5155_vm1, %v5154_v3 }
 0x858   :  { %4273 = vmatprep.mubr.msk.f32.mxu1 %vm5155_vm1, %v5154_v3 }
 0x859   :  { %4704 = vmatpush3.bf16.msra.mxu0 %v5346_v43 }
 0x85a   :  { %4705 = vmatprep.subr.bf16.mxu0 %v5156_v10  ;;  %4716 = vmatpush3.bf16.msra.mxu1 %v5286_v12 }
 0x85b   :  { %4717 = vmatprep.subr.bf16.mxu1 %v5156_v10 }
 0x85d   :  { %4707 = vmatpush3.bf16.msra.mxu0 %v5362_v47 }
 0x85e   :  { %4708 = vmatprep.subr.bf16.mxu0 %v5156_v10 }
 0x861   :  { %4710 = vmatpush3.bf16.msra.mxu0 %v5376_v51 }
 0x862   :  { %4729 = vmatprep.subr.bf16.mxu0 %v5156_v10 }
 0x927   :  { %v1004_v31 = vpop.f32.mrb[10].mxu0 }
 0x928   :  { %v1009_v32 = vrot.slane %v1004_v31, 4  ;;  %v908_v33 = vpop.f32.mrb[10].mxu1  ;;  %v4245_v35 = vpop.f32.mrb[11].mxu0 }
 0x929   :  { %v909_v34 = vadd.f32 %v5408_v60, %v908_v33  ;;  %v4234_v36 = vpop.f32.mrb[11].mxu1 }
 0x92a   :  { %v1011_v37 = vadd.f32 %v1009_v32, %v5304_v15 }
 0x92b   :  { %4985 = vtanh.f32 %v909_v34  ;;  %v3829_v40 = vmul.f32 -1.442695, %v909_v34 }
 0x92c   :  { %4987 = vtanh.f32 %v1011_v37  ;;  %v3831_v42 = vmul.f32 -1.442695, %v1011_v37 }
 0x92d   :  { %4989 = vpow2.f32 %v3829_v40 }
 0x92e   :  { %4991 = vpow2.f32 %v3831_v42 }
 0x935   :  { %v4986_v38 = vpop.eup %4985 }
 0x936   :  { %v4988_v39 = vpop.eup %4987  ;;  %921 = vrot.lane.b32.xlu1 %v4986_v38, %s5157_s30 }
 0x937   :  { %1024 = vrot.lane.b32.xlu0 %v4988_v39, %s5157_s30  ;;  %v4990_v44 = vpop.eup %4989 }
 0x938   :  { %v4992_v45 = vpop.eup %4991  ;;  %v915_v46 = vadd.f32 1.0, %v4990_v44 }
 0x939   :  { %v1015_v48 = vadd.f32 1.0, %v4992_v45 }
 0x93a   :  { %4993 = vrcp.f32 %v915_v46 }
 0x93b   :  { %4995 = vrcp.f32 %v1015_v48 }
 0x944   :  { %v4994_v49 = vpop.eup %4993 }
 0x945   :  { %v4996_v50 = vpop.eup %4995  ;;  %v919_v58 = vmul.f32 %v4994_v49, %v5455_v17 }
 0x946   :  { %v1022_v61 = vmul.f32 %v4996_v50, %v1020_v57 }
 0x9a8   :  { %v922_v15 = vpop.permute.xlu1 %921 }
 0x9a9   :  { %v924_v52 = vmul.f32 %v4994_v49, %v922_v15  ;;  %v1025_v53 = vpop.permute.xlu0 %1024 }
 0x9aa   :  { %v1027_v55 = vmul.f32 %v4996_v50, %v1025_v53 }
 0x9ab   :  { %926 = vrot.lane.b32.xlu1 %v924_v52, %s5158_s4 }
 0x9ac   :  { %1029 = vrot.lane.b32.xlu0 %v1027_v55, %s5158_s4 }
 0xa1d   :  { %v927_v59 = vpop.permute.xlu1 %926 }
 0xa1e   :  { %v5492_v62 = vadd.f32 %v927_v59, %v919_v58  ;;  %v1030_v63 = vpop.permute.xlu0 %1029 }
 0xa1f   :  { %v5494_v0 = vadd.f32 %v1030_v63, %v1022_v61 }
 0xa20   :  { %4997 = vtanh.f32 %v5492_v62 }
 0xa21   :  { %4999 = vtanh.f32 %v5494_v0  ;;  %v1231_v42 = vrot.slane %v5494_v0, 4 }
 0xa2a   :  { %v4998_v1 = vpop.eup %4997 }
 0xa2b   :  { %v5000_v2 = vpop.eup %4999  ;;  %932 = vrot.lane.b32.xlu1 %v4998_v1, %s5157_s30 }
 0xa2c   :  { %1035 = vrot.lane.b32.xlu0 %v5000_v2, %s5157_s30 }
 0xa9d   :  { %v933_v4 = vpop.permute.xlu1 %932 }
 0xa9e   :  { %v935_v5 = vmul.f32 %v4994_v49, %v933_v4  ;;  %v1036_v6 = vpop.permute.xlu0 %1035 }
 0xa9f   :  { %v1038_v8 = vmul.f32 %v4996_v50, %v1036_v6 }
 0xaa0   :  { %v1044_v9 = vrot.slane %v935_v5, 4 }
 0xaa1   :  { %1040 = vrot.lane.b32.xlu1 %v1038_v8, %s5158_s4  ;;  %v1147_v11 = vrot.slane %v1038_v8, 4 }
 0xaa2   :  { %1045 = vrot.lane.b32.xlu0 %v1044_v9, %s5157_s30 }
 0xaa5   :  { %1148 = vrot.lane.b32.xlu1 %v1147_v11, %s5158_s4 }
 0xb13   :  { %v1041_v13 = vpop.permute.xlu1 %1040 }
 0xb14   :  { %v1046_v14 = vpop.permute.xlu0 %1045 }
 0xb15   :  { %v1048_v16 = vsel %vm308_vm4, %v1041_v13, %v1046_v14 }
 0xb16   :  { %v1050_v17 = vrot.slane %v1048_v16, 4 }
 0xb17   :  { %v1149_v19 = vpop.permute.xlu1 %1148 }
 0xb18   :  { %4263 = vmatmul.mubr.msk.f32.vlgmr.msra.gmra.mrb[12].mxu0 %vm418_vm5, %v1050_v17  ;;  %4274 = vmatmul.mubr.msk.f32.vlgmr.msra.gmra.mrb[12].mxu1 %vm308_vm4, %v1149_v19 }
 0xb19   :  { %4719 = vmatpush3.bf16.msra.mxu1 %v5338_v41  ;;  %4731 = vmatpush3.bf16.msra.mxu0 %v5271_v7 }
 0xb1a   :  { %4720 = vmatprep.subr.bf16.mxu1 %v5156_v10  ;;  %4732 = vmatprep.subr.bf16.mxu0 %v5156_v10 }
 0xb1b   :  { %4303 = vmatprep.mubr.msk.f32.mxu0 %vm5155_vm1, %v5154_v3  ;;  %4292 = vmatprep.mubr.msk.f32.mxu1 %vm5155_vm1, %v5154_v3 }
 0xb1d   :  { %4722 = vmatpush3.bf16.msra.mxu1 %v5346_v43  ;;  %4734 = vmatpush3.bf16.msra.mxu0 %v5286_v12 }
 0xb1e   :  { %4723 = vmatprep.subr.bf16.mxu1 %v5156_v10  ;;  %4735 = vmatprep.subr.bf16.mxu0 %v5156_v10 }
 0xb21   :  { %4725 = vmatpush3.bf16.msra.mxu1 %v5362_v47 }
 0xb22   :  { %4726 = vmatprep.subr.bf16.mxu1 %v5156_v10 }
 0xb25   :  { %4728 = vmatpush3.bf16.msra.mxu1 %v5376_v51 }
 0xb26   :  { %4747 = vmatprep.subr.bf16.mxu1 %v5156_v10 }
 0xbeb   :  { %v1119_v21 = vpop.f32.mrb[12].mxu0  ;;  %v1218_v22 = vpop.f32.mrb[12].mxu1 }
 0xbec   :  { %v1120_v23 = vadd.f32 %v5408_v60, %v1119_v21  ;;  %v1222_v24 = vadd.f32 %v1218_v22, %v5308_v20  ;;  %v4264_v25 = vpop.f32.mrb[13].mxu0  ;;  %v4275_v26 = vpop.f32.mrb[13].mxu1 }
 0xbee   :  { %5001 = vtanh.f32 %v1120_v23  ;;  %v3833_v29 = vmul.f32 -1.442695, %v1120_v23  ;;  %v3835_v30 = vmul.f32 -1.442695, %v1222_v24 }
 0xbef   :  { %5003 = vtanh.f32 %v1222_v24 }
 0xbf0   :  { %5005 = vpow2.f32 %v3833_v29 }
 0xbf1   :  { %5007 = vpow2.f32 %v3835_v30 }
 0xbf8   :  { %v5002_v27 = vpop.eup %5001 }
 0xbf9   :  { %v5004_v28 = vpop.eup %5003  ;;  %1132 = vrot.lane.b32.xlu0 %v5002_v27, %s5157_s30 }
 0xbfa   :  { %1235 = vrot.lane.b32.xlu1 %v5004_v28, %s5157_s30  ;;  %v5006_v31 = vpop.eup %5005 }
 0xbfb   :  { %v5008_v32 = vpop.eup %5007  ;;  %v1126_v33 = vadd.f32 1.0, %v5006_v31 }
 0xbfc   :  { %v1226_v35 = vadd.f32 1.0, %v5008_v32 }
 0xbfd   :  { %5009 = vrcp.f32 %v1126_v33 }
 0xbfe   :  { %5011 = vrcp.f32 %v1226_v35 }
 0xc07   :  { %v5010_v34 = vpop.eup %5009 }
 0xc08   :  { %v5012_v37 = vpop.eup %5011  ;;  %v1130_v44 = vmul.f32 %v5010_v34, %v5492_v62 }
 0xc09   :  { %v1233_v46 = vmul.f32 %v5012_v37, %v1231_v42 }
 0xc6b   :  { %v1133_v36 = vpop.permute.xlu0 %1132 }
 0xc6c   :  { %v1135_v38 = vmul.f32 %v5010_v34, %v1133_v36  ;;  %v1236_v39 = vpop.permute.xlu1 %1235 }
 0xc6d   :  { %v1238_v40 = vmul.f32 %v5012_v37, %v1236_v39 }
 0xc6e   :  { %1137 = vrot.lane.b32.xlu0 %v1135_v38, %s5158_s4 }
 0xc6f   :  { %1240 = vrot.lane.b32.xlu1 %v1238_v40, %s5158_s4 }
 0xce0   :  { %v1138_v45 = vpop.permute.xlu0 %1137 }
 0xce1   :  { %v5530_v48 = vadd.f32 %v1138_v45, %v1130_v44  ;;  %v1241_v49 = vpop.permute.xlu1 %1240 }
 0xce2   :  { %v5532_v15 = vadd.f32 %v1241_v49, %v1233_v46 }
 0xce3   :  { %5013 = vtanh.f32 %v5530_v48 }
 0xce4   :  { %5015 = vtanh.f32 %v5532_v15  ;;  %v1440_v26 = vrot.slane %v5532_v15, 4 }
 0xced   :  { %v5014_v50 = vpop.eup %5013 }
 0xcee   :  { %v5016_v52 = vpop.eup %5015  ;;  %1143 = vrot.lane.b32.xlu0 %v5014_v50, %s5157_s30 }
 0xcef   :  { %1246 = vrot.lane.b32.xlu1 %v5016_v52, %s5157_s30 }
 0xd60   :  { %v1144_v53 = vpop.permute.xlu0 %1143 }
 0xd61   :  { %v1146_v55 = vmul.f32 %v5010_v34, %v1144_v53  ;;  %v1247_v57 = vpop.permute.xlu1 %1246 }
 0xd62   :  { %v1249_v58 = vmul.f32 %v5012_v37, %v1247_v57 }
 0xd63   :  { %1255 = vrot.lane.b32.xlu1 %v1146_v55, %s5157_s30 }
 0xd64   :  { %1251 = vrot.lane.b32.xlu0 %v1249_v58, %s5158_s4 }
 0xdd5   :  { %v1256_v59 = vpop.permute.xlu1 %1255 }
 0xdd6   :  { %v1252_v61 = vpop.permute.xlu0 %1251 }
 0xdd7   :  { %v1258_v62 = vsel %vm308_vm4, %v1252_v61, %v1256_v59  ;;  %4304 = vmatmul.mubr.msk.f32.vlgmr.msra.gmra.mrb[14].mxu0 %vm308_vm4, %v1252_v61 }
 0xdd8   :  { %4293 = vmatmul.mubr.msk.f32.vlgmr.msra.gmra.mrb[14].mxu1 %vm418_vm5, %v1258_v62  ;;  %4737 = vmatpush3.bf16.msra.mxu0 %v5338_v41 }
 0xdd9   :  { %4738 = vmatprep.subr.bf16.mxu0 %v5156_v10  ;;  %4749 = vmatpush3.bf16.msra.mxu1 %v5271_v7 }
 0xdda   :  { %4750 = vmatprep.subr.bf16.mxu1 %v5156_v10  ;;  %4322 = vmatprep.mubr.msk.f32.mxu0 %vm5155_vm1, %v5154_v3 }
 0xddb   :  { %4333 = vmatprep.mubr.msk.f32.mxu1 %vm5155_vm1, %v5154_v3 }
 0xddc   :  { %4740 = vmatpush3.bf16.msra.mxu0 %v5346_v43 }
 0xddd   :  { %4741 = vmatprep.subr.bf16.mxu0 %v5156_v10  ;;  %4752 = vmatpush3.bf16.msra.mxu1 %v5286_v12 }
 0xdde   :  { %4753 = vmatprep.subr.bf16.mxu1 %v5156_v10 }
 0xde0   :  { %4743 = vmatpush3.bf16.msra.mxu0 %v5362_v47 }
 0xde1   :  { %4744 = vmatprep.subr.bf16.mxu0 %v5156_v10 }
 0xde4   :  { %4746 = vmatpush3.bf16.msra.mxu0 %v5376_v51 }
 0xde5   :  { %4765 = vmatprep.subr.bf16.mxu0 %v5156_v10 }
 0xeaa   :  { %v1424_v63 = vpop.f32.mrb[14].mxu0 }
 0xeab   :  { %v1429_v0 = vrot.slane %v1424_v63, 4  ;;  %v1328_v1 = vpop.f32.mrb[14].mxu1  ;;  %v4305_v2 = vpop.f32.mrb[15].mxu0 }
 0xeac   :  { %v1329_v4 = vadd.f32 %v5408_v60, %v1328_v1  ;;  %v4294_v5 = vpop.f32.mrb[15].mxu1 }
 0xead   :  { %v1431_v6 = vadd.f32 %v1429_v0, %v5308_v20 }
 0xeae   :  { %5017 = vtanh.f32 %v1329_v4  ;;  %v3837_v11 = vmul.f32 -1.442695, %v1329_v4 }
 0xeaf   :  { %5019 = vtanh.f32 %v1431_v6  ;;  %v3839_v13 = vmul.f32 -1.442695, %v1431_v6 }
 0xeb0   :  { %5021 = vpow2.f32 %v3837_v11 }
 0xeb1   :  { %5023 = vpow2.f32 %v3839_v13 }
 0xeb8   :  { %v5018_v8 = vpop.eup %5017 }
 0xeb9   :  { %v5020_v9 = vpop.eup %5019  ;;  %1341 = vrot.lane.b32.xlu0 %v5018_v8, %s5157_s30 }
 0xeba   :  { %1444 = vrot.lane.b32.xlu1 %v5020_v9, %s5157_s30  ;;  %v5022_v14 = vpop.eup %5021 }
 0xebb   :  { %v5024_v16 = vpop.eup %5023  ;;  %v1335_v17 = vadd.f32 1.0, %v5022_v14 }
 0xebc   :  { %v1435_v19 = vadd.f32 1.0, %v5024_v16 }
 0xebd   :  { %5025 = vrcp.f32 %v1335_v17 }
 0xebe   :  { %5027 = vrcp.f32 %v1435_v19 }
 0xec7   :  { %v5026_v21 = vpop.eup %5025 }
 0xec8   :  { %v5028_v22 = vpop.eup %5027  ;;  %v1339_v27 = vmul.f32 %v5026_v21, %v5530_v48 }
 0xec9   :  { %v1442_v29 = vmul.f32 %v5028_v22, %v1440_v26 }
 0xf2b   :  { %v1342_v20 = vpop.permute.xlu0 %1341 }
 0xf2c   :  { %v1344_v23 = vmul.f32 %v5026_v21, %v1342_v20  ;;  %v1445_v24 = vpop.permute.xlu1 %1444 }
 0xf2d   :  { %v1447_v25 = vmul.f32 %v5028_v22, %v1445_v24 }
 0xf2e   :  { %1346 = vrot.lane.b32.xlu0 %v1344_v23, %s5158_s4 }
 0xf2f   :  { %1449 = vrot.lane.b32.xlu1 %v1447_v25, %s5158_s4 }
 0xfa0   :  { %v1347_v28 = vpop.permute.xlu0 %1346 }
 0xfa1   :  { %v5567_v30 = vadd.f32 %v1347_v28, %v1339_v27  ;;  %v1450_v31 = vpop.permute.xlu1 %1449 }
 0xfa2   :  { %v5569_v32 = vadd.f32 %v1450_v31, %v1442_v29 }
 0xfa3   :  { %5029 = vtanh.f32 %v5567_v30 }
 0xfa4   :  { %5031 = vtanh.f32 %v5569_v32  ;;  %v1651_v8 = vrot.slane %v5569_v32, 4 }
 0xfad   :  { %v5030_v33 = vpop.eup %5029 }
 0xfae   :  { %v5032_v35 = vpop.eup %5031  ;;  %1352 = vrot.lane.b32.xlu0 %v5030_v33, %s5157_s30 }
 0xfaf   :  { %1455 = vrot.lane.b32.xlu1 %v5032_v35, %s5157_s30 }
0x1020   :  { %v1353_v34 = vpop.permute.xlu0 %1352 }
0x1021   :  { %v1355_v36 = vmul.f32 %v5026_v21, %v1353_v34  ;;  %v1456_v37 = vpop.permute.xlu1 %1455 }
0x1022   :  { %v1458_v38 = vmul.f32 %v5028_v22, %v1456_v37 }
0x1023   :  { %v1464_v39 = vrot.slane %v1355_v36, 4 }
0x1024   :  { %1460 = vrot.lane.b32.xlu0 %v1458_v38, %s5158_s4  ;;  %v1567_v40 = vrot.slane %v1458_v38, 4 }
0x1025   :  { %1465 = vrot.lane.b32.xlu1 %v1464_v39, %s5157_s30 }
0x1028   :  { %1568 = vrot.lane.b32.xlu0 %v1567_v40, %s5158_s4 }
0x1096   :  { %v1461_v42 = vpop.permute.xlu0 %1460 }
0x1097   :  { %v1466_v44 = vpop.permute.xlu1 %1465 }
0x1098   :  { %v1468_v45 = vsel %vm308_vm4, %v1461_v42, %v1466_v44 }
0x1099   :  { %v1470_v46 = vrot.slane %v1468_v45, 4 }
0x109a   :  { %v1569_v48 = vpop.permute.xlu0 %1568 }
0x109b   :  { %4323 = vmatmul.mubr.msk.f32.vlgmr.msra.gmra.mrb[16].mxu0 %vm418_vm5, %v1470_v46  ;;  %4334 = vmatmul.mubr.msk.f32.vlgmr.msra.gmra.mrb[16].mxu1 %vm308_vm4, %v1569_v48 }
0x109c   :  { %4755 = vmatpush3.bf16.msra.mxu1 %v5338_v41  ;;  %4767 = vmatpush3.bf16.msra.mxu0 %v5271_v7 }
0x109d   :  { %4756 = vmatprep.subr.bf16.mxu1 %v5156_v10  ;;  %4768 = vmatprep.subr.bf16.mxu0 %v5156_v10 }
0x109e   :  { %4363 = vmatprep.mubr.msk.f32.mxu0 %vm5155_vm1, %v5154_v3  ;;  %4352 = vmatprep.mubr.msk.f32.mxu1 %vm5155_vm1, %v5154_v3 }
0x10a0   :  { %4758 = vmatpush3.bf16.msra.mxu1 %v5346_v43  ;;  %4770 = vmatpush3.bf16.msra.mxu0 %v5286_v12 }
0x10a1   :  { %4759 = vmatprep.subr.bf16.mxu1 %v5156_v10  ;;  %4771 = vmatprep.subr.bf16.mxu0 %v5156_v10 }
0x10a4   :  { %4761 = vmatpush3.bf16.msra.mxu1 %v5362_v47 }
0x10a5   :  { %4762 = vmatprep.subr.bf16.mxu1 %v5156_v10 }
0x10a8   :  { %4764 = vmatpush3.bf16.msra.mxu1 %v5376_v51 }
0x10a9   :  { %4385 = vmatprep.subr.mxu1 %v5154_v3 }
0x116e   :  { %v1539_v7 = vpop.f32.mrb[16].mxu0  ;;  %v1638_v49 = vpop.f32.mrb[16].mxu1 }
0x116f   :  { %v1540_v15 = vadd.f32 %v5408_v60, %v1539_v7  ;;  %v1642_v50 = vadd.f32 %v1638_v49, %v5306_v18  ;;  %v4324_v52 = vpop.f32.mrb[17].mxu0  ;;  %v4335_v12 = vpop.f32.mrb[17].mxu1 }
0x1170   :  { %v5153_v12 = vld [vmem:[%s6075_s29 + $0x18] sm:$0xff] }
0x1171   :  { %5033 = vtanh.f32 %v1540_v15  ;;  %v3841_v57 = vmul.f32 -1.442695, %v1540_v15  ;;  %v3843_v58 = vmul.f32 -1.442695, %v1642_v50 }
0x1172   :  { %5035 = vtanh.f32 %v1642_v50 }
0x1173   :  { %5037 = vpow2.f32 %v3841_v57  ;;  %v80_v57 = vld [vmem:[%s6062_s9] sm:$0xff] }
0x1174   :  { %5039 = vpow2.f32 %v3843_v58  ;;  %v81_v58 = vld [vmem:[%s6062_s9 + $0x8] sm:$0xff] }
0x117b   :  { %v5034_v53 = vpop.eup %5033 }
0x117c   :  { %v5036_v55 = vpop.eup %5035  ;;  %1552 = vrot.lane.b32.xlu1 %v5034_v53, %s5157_s30  ;;  %v1987_v53 = vrot.slane %v5153_v12, 4  ;;  %v91_v12 = vld [vmem:[%s6064_s11 + $0x30] sm:$0xff] }
0x117d   :  { %1655 = vrot.lane.b32.xlu0 %v5036_v55, %s5157_s30  ;;  %v5038_v59 = vpop.eup %5037  ;;  %v78_v55 = vld [vmem:[%s6061_s7] sm:$0x3] }
0x117e   :  { %v5040_v61 = vpop.eup %5039  ;;  %v1546_v62 = vadd.f32 1.0, %v5038_v59  ;;  %v5652_v59 = vpack.c.bf16 %v81_v58, %v80_v57 }
0x117f   :  { %v1646_v63 = vadd.f32 1.0, %v5040_v61 }
0x1180   :  { %5041 = vrcp.f32 %v1546_v62 }
0x1181   :  { %5043 = vrcp.f32 %v1646_v63  ;;  %v82_v63 = vld [vmem:[%s6062_s9 + $0x10] sm:$0xff] }
0x118a   :  { %v5042_v0 = vpop.eup %5041 }
0x118b   :  { %v5044_v2 = vpop.eup %5043  ;;  %v1550_v9 = vmul.f32 %v5042_v0, %v5567_v30 }
0x118c   :  { %v1653_v13 = vmul.f32 %v5044_v2, %v1651_v8 }
0x11ee   :  { %v1553_v1 = vpop.permute.xlu1 %1552 }
0x11ef   :  { %v1555_v4 = vmul.f32 %v5042_v0, %v1553_v1  ;;  %v1656_v5 = vpop.permute.xlu0 %1655 }
0x11f0   :  { %v1658_v6 = vmul.f32 %v5044_v2, %v1656_v5 }
0x11f1   :  { %1557 = vrot.lane.b32.xlu1 %v1555_v4, %s5158_s4 }
0x11f2   :  { %1660 = vrot.lane.b32.xlu0 %v1658_v6, %s5158_s4 }
0x1263   :  { %v1558_v11 = vpop.permute.xlu1 %1557 }
0x1264   :  { %v1560_v14 = vadd.f32 %v1558_v11, %v1550_v9  ;;  %v1661_v16 = vpop.permute.xlu0 %1660 }
0x1265   :  { %v5605_v17 = vadd.f32 %v1661_v16, %v1653_v13 }
0x1266   :  { %5045 = vtanh.f32 %v1560_v14 }
0x1267   :  { %5047 = vtanh.f32 %v5605_v17  ;;  %v1860_v46 = vrot.slane %v5605_v17, 4 }
0x1270   :  { %v5046_v19 = vpop.eup %5045 }
0x1271   :  { %v5048_v21 = vpop.eup %5047  ;;  %1563 = vrot.lane.b32.xlu1 %v5046_v19, %s5157_s30  ;;  %v5684_v19 = vld [vmem:[%s6063_s10] ss:$0 sm:$0xff] }
0x1272   :  { %1666 = vrot.lane.b32.xlu0 %v5048_v21, %s5157_s30  ;;  %v5688_v21 = vadd.f32 %v5684_v19, %v5382_v54 }
0x12e3   :  { %v1564_v20 = vpop.permute.xlu1 %1563 }
0x12e4   :  { %v1566_v22 = vmul.f32 %v5042_v0, %v1564_v20  ;;  %v1667_v23 = vpop.permute.xlu0 %1666  ;;  %v83_v0 = vld [vmem:[%s6062_s9 + $0x18] sm:$0xff] }
0x12e5   :  { %v1669_v24 = vmul.f32 %v5044_v2, %v1667_v23  ;;  %v5667_v1 = vpack.c.bf16 %v83_v0, %v82_v63 }
0x12e6   :  { %1675 = vrot.lane.b32.xlu0 %v1566_v22, %s5157_s30 }
0x12e7   :  { %1671 = vrot.lane.b32.xlu1 %v1669_v24, %s5158_s4 }
0x1358   :  { %v1676_v25 = vpop.permute.xlu0 %1675 }
0x1359   :  { %v1672_v26 = vpop.permute.xlu1 %1671 }
0x135a   :  { %v1678_v27 = vsel %vm308_vm4, %v1672_v26, %v1676_v25  ;;  %4364 = vmatmul.mubr.msk.f32.vlgmr.msra.gmra.mrb[18].mxu0 %vm308_vm4, %v1672_v26 }
0x135b   :  { %4353 = vmatmul.mubr.msk.f32.vlgmr.msra.gmra.mrb[18].mxu1 %vm418_vm5, %v1678_v27  ;;  %4773 = vmatpush3.bf16.msra.mxu0 %v5338_v41 }
0x135c   :  { %4774 = vmatprep.subr.bf16.mxu0 %v5156_v10  ;;  %4387 = vmatprep.mubr.msk.f32.mxu1 %vm5155_vm1, %v5154_v3 }
0x135d   :  { %4382 = vmatprep.mubr.msk.f32.mxu0 %vm5155_vm1, %v5154_v3  ;;  %4386 = vmatpush3.msk.msra.mxu1 %vm1991_vm6, %v78_v55 }
0x135e   :  { %4783 = vmatprep.subr.bf16.mxu1 %v5156_v10 }
0x135f   :  { %4776 = vmatpush3.bf16.msra.mxu0 %v5346_v43  ;;  %4388 = vmatmul.mubr.msk.f32.vlgmr.msra.gmra.mrb[20].mxu1 %vm1988_vm7, %v1987_v53  ;;  %v92_v53 = vld [vmem:[%s6064_s11 + $0x38] sm:$0xff] }
0x1360   :  { %4777 = vmatprep.subr.bf16.mxu0 %v5156_v10  ;;  %4785 = vmatpush3.bf16.msra.mxu1 %v5652_v59  ;;  %v5741_v57 = vpack.c.bf16 %v92_v53, %v91_v12 }
0x1361   :  { %4398 = vmatprep.mubr.msk.f32.mxu1 %vm5155_vm1, %v5154_v3  ;;  %4786 = vmatprep.subr.bf16.mxu1 %v5156_v10 }
0x1363   :  { %4779 = vmatpush3.bf16.msra.mxu0 %v5362_v47 }
0x1364   :  { %4780 = vmatprep.subr.bf16.mxu0 %v5156_v10  ;;  %4788 = vmatpush3.bf16.msra.mxu1 %v5667_v1 }
0x1365   :  { %4789 = vmatprep.subr.bf16.mxu1 %v5156_v10 }
0x1367   :  { %4782 = vmatpush3.bf16.msra.mxu0 %v5376_v51 }
0x1368   :  { %4801 = vmatprep.subr.bf16.mxu0 %v5156_v10 }
0x142d   :  { %v1844_v41 = vpop.f32.mrb[18].mxu0 }
0x142e   :  { %v1849_v28 = vrot.slane %v1844_v41, 4  ;;  %v1748_v29 = vpop.f32.mrb[18].mxu1  ;;  %v4365_v30 = vpop.f32.mrb[19].mxu0 }
0x142f   :  { %v1749_v31 = vadd.f32 %v5408_v60, %v1748_v29  ;;  %v4354_v32 = vpop.f32.mrb[19].mxu1 }
0x1430   :  { %v1851_v33 = vadd.f32 %v1849_v28, %v5306_v18 }
0x1431   :  { %5049 = vtanh.f32 %v1749_v31  ;;  %v3845_v47 = vmul.f32 -1.442695, %v1749_v31 }
0x1432   :  { %5051 = vtanh.f32 %v1851_v33  ;;  %v3847_v51 = vmul.f32 -1.442695, %v1851_v33 }
0x1433   :  { %5053 = vpow2.f32 %v3845_v47 }
0x1434   :  { %5055 = vpow2.f32 %v3847_v51 }
0x143b   :  { %v5050_v43 = vpop.eup %5049 }
0x143c   :  { %v5052_v35 = vpop.eup %5051  ;;  %1761 = vrot.lane.b32.xlu1 %v5050_v43, %s5157_s30 }
0x143d   :  { %1864 = vrot.lane.b32.xlu0 %v5052_v35, %s5157_s30  ;;  %v5054_v34 = vpop.eup %5053 }
0x143e   :  { %v5056_v36 = vpop.eup %5055  ;;  %v1755_v37 = vadd.f32 1.0, %v5054_v34 }
0x143f   :  { %v1855_v38 = vadd.f32 1.0, %v5056_v36 }
0x1440   :  { %5057 = vrcp.f32 %v1755_v37 }
0x1441   :  { %5059 = vrcp.f32 %v1855_v38 }
0x144a   :  { %v5058_v39 = vpop.eup %5057 }
0x144b   :  { %v5060_v40 = vpop.eup %5059  ;;  %v1759_v48 = vmul.f32 %v5058_v39, %v1560_v14 }
0x144c   :  { %v1862_v49 = vmul.f32 %v5060_v40, %v1860_v46 }
0x14ae   :  { %v1762_v18 = vpop.permute.xlu1 %1761 }
0x14af   :  { %v1764_v42 = vmul.f32 %v5058_v39, %v1762_v18  ;;  %v1865_v44 = vpop.permute.xlu0 %1864 }
0x14b0   :  { %v1867_v45 = vmul.f32 %v5060_v40, %v1865_v44  ;;  %v86_v44 = vld [vmem:[%s6064_s11 + $0x8] sm:$0xff] }
0x14b1   :  { %1766 = vrot.lane.b32.xlu1 %v1764_v42, %s5158_s4  ;;  %v85_v42 = vld [vmem:[%s6064_s11] sm:$0xff] }
0x14b2   :  { %1869 = vrot.lane.b32.xlu0 %v1867_v45, %s5158_s4  ;;  %v87_v45 = vld [vmem:[%s6064_s11 + $0x10] sm:$0xff]  ;;  %v5713_v46 = vpack.c.bf16 %v86_v44, %v85_v42  ;;  %v5849_v44 = vld [vmem:[%s6070_s16] ss:$0 sm:$0xff] }
0x1523   :  { %v1767_v7 = vpop.permute.xlu1 %1766 }
0x1524   :  { %v5634_v15 = vadd.f32 %v1767_v7, %v1759_v48  ;;  %v1870_v50 = vpop.permute.xlu0 %1869  ;;  %v88_v48 = vld [vmem:[%s6064_s11 + $0x18] sm:$0xff] }
0x1525   :  { %v5636_v52 = vadd.f32 %v1870_v50, %v1862_v49  ;;  %v5719_v7 = vpack.c.bf16 %v88_v48, %v87_v45  ;;  %v89_v49 = vld [vmem:[%s6064_s11 + $0x20] sm:$0xff] }
0x1526   :  { %5061 = vtanh.f32 %v5634_v15 }
0x1527   :  { %5063 = vtanh.f32 %v5636_v52  ;;  %v2150_v34 = vrot.slane %v5636_v52, 4 }
0x1530   :  { %v5062_v61 = vpop.eup %5061 }
0x1531   :  { %v5064_v62 = vpop.eup %5063  ;;  %1772 = vrot.lane.b32.xlu1 %v5062_v61, %s5157_s30 }
0x1532   :  { %1875 = vrot.lane.b32.xlu0 %v5064_v62, %s5157_s30 }
0x15a3   :  { %v1773_v2 = vpop.permute.xlu1 %1772 }
0x15a4   :  { %v1775_v4 = vmul.f32 %v5058_v39, %v1773_v2  ;;  %v1876_v5 = vpop.permute.xlu0 %1875 }
0x15a5   :  { %v1878_v6 = vmul.f32 %v5060_v40, %v1876_v5  ;;  %v5762_v5 = vld [vmem:[%s6065_s12] ss:$0 sm:$0xff] }
0x15a6   :  { %v1884_v8 = vrot.slane %v1775_v4, 4 }
0x15a7   :  { %1880 = vrot.lane.b32.xlu1 %v1878_v6, %s5158_s4  ;;  %v2066_v9 = vrot.slane %v1878_v6, 4 }
0x15a8   :  { %1885 = vrot.lane.b32.xlu0 %v1884_v8, %s5157_s30 }
0x15ab   :  { %2067 = vrot.lane.b32.xlu1 %v2066_v9, %s5158_s4 }
0x1619   :  { %v1881_v11 = vpop.permute.xlu1 %1880 }
0x161a   :  { %v1886_v13 = vpop.permute.xlu0 %1885 }
0x161b   :  { %v1888_v14 = vsel %vm308_vm4, %v1881_v11, %v1886_v13 }
0x161c   :  { %v1890_v16 = vrot.slane %v1888_v14, 4 }
0x161d   :  { %v2068_v17 = vpop.permute.xlu1 %2067 }
0x161e   :  { %4383 = vmatmul.mubr.msk.f32.vlgmr.msra.gmra.mrb[20].mxu0 %vm418_vm5, %v1890_v16  ;;  %4399 = vmatmul.mubr.msk.f32.vlgmr.msra.gmra.mrb[20].mxu1 %vm308_vm4, %v2068_v17 }
0x161f   :  { %4417 = vmatprep.mubr.msk.f32.mxu1 %vm5155_vm1, %v5154_v3  ;;  %4428 = vmatprep.mubr.msk.f32.mxu0 %vm5155_vm1, %v5154_v3 }
0x1620   :  { %4791 = vmatpush3.bf16.msra.mxu1 %v5713_v46 }
0x1621   :  { %4792 = vmatprep.subr.bf16.mxu1 %v5156_v10 }
0x1624   :  { %4794 = vmatpush3.bf16.msra.mxu1 %v5719_v7 }
0x1625   :  { %4795 = vmatprep.subr.bf16.mxu1 %v5156_v10 }
0x16f1   :  { %v1959_v20 = vpop.f32.mrb[20].mxu0  ;;  %v2137_v22 = vpop.f32.mrb[20].mxu1 }
0x16f2   :  { %v1960_v23 = vadd.f32 %v5408_v60, %v1959_v20  ;;  %v4929_v24 = vadd.f32 %v2137_v22, %v5688_v21  ;;  %v4384_v25 = vpop.f32.mrb[21].mxu0  ;;  %v4400_v26 = vpop.f32.mrb[21].mxu1 }
0x16f4   :  { %5065 = vtanh.f32 %v1960_v23  ;;  %v3849_v28 = vmul.f32 -1.442695, %v1960_v23  ;;  %v3853_v29 = vmul.f32 -1.442695, %v4929_v24 }
0x16f5   :  { %5067 = vtanh.f32 %v4929_v24 }
0x16f6   :  { %5069 = vpow2.f32 %v3849_v28  ;;  %v95_v28 = vld [vmem:[%s6066_s13 + $0x8] sm:$0xff] }
0x16f7   :  { %5071 = vpow2.f32 %v3853_v29  ;;  %v96_v29 = vld [vmem:[%s6066_s13 + $0x10] sm:$0xff] }
0x16fe   :  { %v5066_v27 = vpop.eup %5065 }
0x16ff   :  { %v5068_v41 = vpop.eup %5067  ;;  %1972 = vrot.lane.b32.xlu0 %v5066_v27, %s5157_s30 }
0x1700   :  { %2154 = vrot.lane.b32.xlu1 %v5068_v41, %s5157_s30  ;;  %v5070_v54 = vpop.eup %5069  ;;  %v94_v41 = vld [vmem:[%s6066_s13] sm:$0xff] }
0x1701   :  { %v5072_v30 = vpop.eup %5071  ;;  %v1966_v31 = vadd.f32 1.0, %v5070_v54  ;;  %v5782_v54 = vpack.c.bf16 %v95_v28, %v94_v41 }
0x1702   :  { %v2145_v60 = vadd.f32 1.0, %v5072_v30  ;;  %v97_v30 = vld [vmem:[%s6066_s13 + $0x18] sm:$0xff] }
0x1703   :  { %5073 = vrcp.f32 %v1966_v31  ;;  %4803 = vmatpush3.bf16.msra.mxu0 %v5782_v54  ;;  %v5788_v31 = vpack.c.bf16 %v97_v30, %v96_v29 }
0x1704   :  { %5075 = vrcp.f32 %v2145_v60  ;;  %4804 = vmatprep.subr.bf16.mxu0 %v5156_v10 }
0x1707   :  { %4806 = vmatpush3.bf16.msra.mxu0 %v5788_v31 }
0x1708   :  { %4807 = vmatprep.subr.bf16.mxu0 %v5156_v10 }
0x170d   :  { %v5074_v32 = vpop.eup %5073 }
0x170e   :  { %v5076_v43 = vpop.eup %5075  ;;  %v1970_v36 = vmul.f32 %v5074_v32, %v5634_v15  ;;  %v90_v15 = vld [vmem:[%s6064_s11 + $0x28] sm:$0xff] }
0x170f   :  { %v2152_v38 = vmul.f32 %v5076_v43, %v2150_v34  ;;  %v5729_v50 = vpack.c.bf16 %v90_v15, %v89_v49  ;;  %v102_v34 = vld [vmem:[%s6067_s15 + $0x18] sm:$0xff] }
0x1711   :  { %4797 = vmatpush3.bf16.msra.mxu1 %v5729_v50 }
0x1712   :  { %4798 = vmatprep.subr.bf16.mxu1 %v5156_v10 }
0x1715   :  { %4800 = vmatpush3.bf16.msra.mxu1 %v5741_v57 }
0x1716   :  { %4813 = vmatprep.subr.bf16.mxu1 %v5156_v10 }
0x1771   :  { %v1973_v33 = vpop.permute.xlu0 %1972 }
0x1772   :  { %v1975_v35 = vmul.f32 %v5074_v32, %v1973_v33  ;;  %v2155_v47 = vpop.permute.xlu1 %2154 }
0x1773   :  { %v2157_v51 = vmul.f32 %v5076_v43, %v2155_v47 }
0x1774   :  { %1977 = vrot.lane.b32.xlu0 %v1975_v35, %s5158_s4  ;;  %v100_v35 = vld [vmem:[%s6067_s15 + $0x8] sm:$0xff] }
0x1775   :  { %2159 = vrot.lane.b32.xlu1 %v2157_v51, %s5158_s4  ;;  %v101_v51 = vld [vmem:[%s6067_s15 + $0x10] sm:$0xff] }
0x17e6   :  { %v1978_v37 = vpop.permute.xlu0 %1977 }
0x17e7   :  { %v5698_v39 = vadd.f32 %v1978_v37, %v1970_v36  ;;  %v2160_v18 = vpop.permute.xlu1 %2159  ;;  %v5818_v37 = vpack.c.bf16 %v102_v34, %v101_v51 }
0x17e8   :  { %v5700_v40 = vadd.f32 %v2160_v18, %v2152_v38  ;;  %v5839_v38 = vld [vmem:[%s6068_s14] ss:$0 sm:$0xff] }
0x17e9   :  { %5077 = vtanh.f32 %v5698_v39 }
0x17ea   :  { %5079 = vtanh.f32 %v5700_v40 }
0x17f3   :  { %v5078_v52 = vpop.eup %5077 }
0x17f4   :  { %v5080_v55 = vpop.eup %5079  ;;  %1983 = vrot.lane.b32.xlu0 %v5078_v52, %s5157_s30 }
0x17f5   :  { %2165 = vrot.lane.b32.xlu1 %v5080_v55, %s5157_s30 }
0x1866   :  { %v1984_v58 = vpop.permute.xlu0 %1983 }
0x1867   :  { %v1986_v61 = vmul.f32 %v5074_v32, %v1984_v58  ;;  %v2166_v62 = vpop.permute.xlu1 %2165 }
0x1868   :  { %v2168_v63 = vmul.f32 %v5076_v43, %v2166_v62  ;;  %v99_v43 = vld [vmem:[%s6067_s15] sm:$0xff] }
0x1869   :  { %2174 = vrot.lane.b32.xlu1 %v1986_v61, %s5157_s30  ;;  %v5808_v47 = vpack.c.bf16 %v100_v35, %v99_v43 }
0x186a   :  { %2170 = vrot.lane.b32.xlu0 %v2168_v63, %s5158_s4 }
0x18db   :  { %v2175_v0 = vpop.permute.xlu1 %2174 }
0x18dc   :  { %v2171_v2 = vpop.permute.xlu0 %2170 }
0x18dd   :  { %v2177_v4 = vsel %vm308_vm4, %v2171_v2, %v2175_v0 }
0x18de   :  { %4418 = vmatmul.mubr.msk.f32.vlgmr.msra.gmra.mrb[22].mxu1 %vm418_vm5, %v2177_v4  ;;  %v2528_v4 = vrot.slane %v5700_v40, 4 }
0x18df   :  { %4815 = vmatpush3.bf16.msra.mxu1 %v5652_v59  ;;  %4450 = vmatprep.mubr.msk.f32.mxu1 %vm5155_vm1, %v5154_v3 }
0x18e0   :  { %4816 = vmatprep.subr.bf16.mxu1 %v5156_v10 }
0x18e3   :  { %4818 = vmatpush3.bf16.msra.mxu1 %v5667_v1 }
0x18e4   :  { %4831 = vmatprep.subr.bf16.mxu1 %v5156_v10 }
0x18e6   :  { %4451 = vmatmul.mubr.msk.f32.vlgmr.msra.gmra.mrb[24].mxu1 %vm308_vm4, %v2171_v2 }
0x18e7   :  { %4480 = vmatprep.mubr.msk.f32.mxu1 %vm5155_vm1, %v5154_v3  ;;  %4833 = vmatpush3.bf16.msra.mxu1 %v5782_v54 }
0x18e8   :  { %4834 = vmatprep.subr.bf16.mxu1 %v5156_v10 }
0x18eb   :  { %4836 = vmatpush3.bf16.msra.mxu1 %v5788_v31 }
0x18ec   :  { %4837 = vmatprep.subr.bf16.mxu1 %v5156_v10 }
0x19b1   :  { %v2253_v6 = vpop.f32.mrb[22].mxu1 }
0x19b2   :  { %v2254_v8 = vadd.f32 %v5762_v5, %v2253_v6  ;;  %v4419_v9 = vpop.f32.mrb[23].mxu1 }
0x19b4   :  { %5081 = vtanh.f32 %v2254_v8  ;;  %v3856_v16 = vmul.f32 -1.442695, %v2254_v8 }
0x19b6   :  { %5083 = vpow2.f32 %v3856_v16 }
0x19b9   :  { %v5765_v11 = vpop.f32.mrb[24].mxu1 }
0x19ba   :  { %v4452_v13 = vpop.f32.mrb[25].mxu1  ;;  %v2517_v52 = vrot.slane %v5765_v11, 4 }
0x19be   :  { %v5082_v14 = vpop.eup %5081 }
0x19bf   :  { %2266 = vrot.lane.b32.xlu0 %v5082_v14, %s5157_s30 }
0x19c0   :  { %v5084_v17 = vpop.eup %5083 }
0x19c1   :  { %v2260_v20 = vadd.f32 1.0, %v5084_v17 }
0x19c3   :  { %5085 = vrcp.f32 %v2260_v20 }
0x19cd   :  { %v5086_v22 = vpop.eup %5085 }
0x19ce   :  { %v2264_v25 = vmul.f32 %v5086_v22, %v5698_v39 }
0x1a31   :  { %v2267_v23 = vpop.permute.xlu0 %2266 }
0x1a32   :  { %v2269_v24 = vmul.f32 %v5086_v22, %v2267_v23 }
0x1a34   :  { %2271 = vrot.lane.b32.xlu1 %v2269_v24, %s5158_s4 }
0x1aa6   :  { %v2272_v26 = vpop.permute.xlu1 %2271 }
0x1aa7   :  { %v5770_v27 = vadd.f32 %v2272_v26, %v2264_v25 }
0x1aa9   :  { %5087 = vtanh.f32 %v5770_v27 }
0x1ab3   :  { %v5088_v60 = vpop.eup %5087 }
0x1ab4   :  { %2277 = vrot.lane.b32.xlu0 %v5088_v60, %s5157_s30 }
0x1b26   :  { %v2278_v32 = vpop.permute.xlu0 %2277 }
0x1b27   :  { %v5798_v33 = vmul.f32 %v5086_v22, %v2278_v32 }
0x1b29   :  { %2288 = vrot.lane.b32.xlu1 %v5798_v33, %s5158_s4  ;;  %v2551_v11 = vrot.slane %v5798_v33, 4 }
0x1b9b   :  { %v2289_v36 = vpop.permute.xlu1 %2288 }
0x1b9c   :  { %4429 = vmatmul.mubr.msk.f32.vlgmr.msra.gmra.mrb[22].mxu0 %vm308_vm4, %v2289_v36 }
0x1b9d   :  { %4809 = vmatpush3.bf16.msra.mxu0 %v5808_v47  ;;  %4439 = vmatprep.mubr.msk.f32.mxu0 %vm5155_vm1, %v5154_v3 }
0x1b9e   :  { %4810 = vmatprep.subr.bf16.mxu0 %v5156_v10 }
0x1ba1   :  { %4812 = vmatpush3.bf16.msra.mxu0 %v5818_v37 }
0x1ba2   :  { %4819 = vmatprep.subr.bf16.mxu0 %v5156_v10 }
0x1ba4   :  { %4440 = vmatmul.mubr.msk.f32.vlgmr.msra.gmra.mrb[24].mxu0 %vm308_vm4, %v2289_v36 }
0x1ba5   :  { %4821 = vmatpush3.bf16.msra.mxu0 %v5713_v46  ;;  %4469 = vmatprep.mubr.msk.f32.mxu0 %vm5155_vm1, %v5154_v3 }
0x1ba6   :  { %4822 = vmatprep.subr.bf16.mxu0 %v5156_v10 }
0x1ba9   :  { %4824 = vmatpush3.bf16.msra.mxu0 %v5719_v7 }
0x1baa   :  { %4825 = vmatprep.subr.bf16.mxu0 %v5156_v10 }
0x1bad   :  { %4827 = vmatpush3.bf16.msra.mxu0 %v5729_v50 }
0x1bae   :  { %4828 = vmatprep.subr.bf16.mxu0 %v5156_v10 }
0x1bb1   :  { %4830 = vmatpush3.bf16.msra.mxu0 %v5741_v57 }
0x1bb2   :  { %4849 = vmatprep.subr.bf16.mxu0 %v5156_v10 }
0x1c6f   :  { %v2358_v39 = vpop.f32.mrb[22].mxu0 }
0x1c70   :  { %v2359_v18 = vadd.f32 %v5839_v38, %v2358_v39  ;;  %v4430_v42 = vpop.f32.mrb[23].mxu0 }
0x1c72   :  { %2363 = vst.msk [vmem:[%s6069_s17] sm:$0xf] %vm2362_vm8, %v2359_v18 }
0x1c77   :  { %v2436_v45 = vpop.f32.mrb[24].mxu0 }
0x1c78   :  { %v2437_v48 = vadd.f32 %v5849_v44, %v2436_v45  ;;  %v4441_v49 = vpop.f32.mrb[25].mxu0 }
0x1c7a   :  { %v2441_v15 = vrot.slane %v2437_v48, 4  ;;  %v5914_v48 = vadd.f32 %v5684_v19, %v5384_v56 }
0x1c7c   :  { %v2443_v12 = vadd.f32 %v2441_v15, %v5688_v21  ;;  %v4930_v49 = vadd.f32 %v5849_v44, %v5914_v48 }
0x1c7e   :  { %v2519_v53 = vadd.f32 %v2517_v52, %v2443_v12 }
0x1c80   :  { %5089 = vtanh.f32 %v2519_v53  ;;  %v3862_v58 = vmul.f32 -1.442695, %v2519_v53 }
0x1c82   :  { %5091 = vpow2.f32 %v3862_v58 }
0x1c8a   :  { %v5090_v55 = vpop.eup %5089 }
0x1c8b   :  { %2532 = vrot.lane.b32.xlu0 %v5090_v55, %s5157_s30 }
0x1c8c   :  { %v5092_v61 = vpop.eup %5091 }
0x1c8d   :  { %v2523_v62 = vadd.f32 1.0, %v5092_v61 }
0x1c8f   :  { %5093 = vrcp.f32 %v2523_v62 }
0x1c99   :  { %v5094_v63 = vpop.eup %5093 }
0x1c9a   :  { %v2530_v6 = vmul.f32 %v5094_v63, %v2528_v4 }
0x1cfd   :  { %v2533_v0 = vpop.permute.xlu0 %2532 }
0x1cfe   :  { %v2535_v2 = vmul.f32 %v5094_v63, %v2533_v0 }
0x1d00   :  { %2537 = vrot.lane.b32.xlu1 %v2535_v2, %s5158_s4 }
0x1d72   :  { %v2538_v8 = vpop.permute.xlu1 %2537 }
0x1d73   :  { %v5857_v21 = vadd.f32 %v2538_v8, %v2530_v6 }
0x1d75   :  { %5095 = vtanh.f32 %v5857_v21  ;;  %v2886_v56 = vrot.slane %v5857_v21, 4 }
0x1d7f   :  { %v5096_v9 = vpop.eup %5095 }
0x1d80   :  { %2543 = vrot.lane.b32.xlu0 %v5096_v9, %s5157_s30 }
0x1d84   :  { %2552 = vrot.lane.b32.xlu0 %v2551_v11, %s5157_s30 }
0x1df2   :  { %v2544_v13 = vpop.permute.xlu0 %2543 }
0x1df3   :  { %v2546_v14 = vmul.f32 %v5094_v63, %v2544_v13 }
0x1df5   :  { %2548 = vrot.lane.b32.xlu1 %v2546_v14, %s5158_s4  ;;  %v2802_v51 = vrot.slane %v2546_v14, 4 }
0x1df6   :  { %v2553_v16 = vpop.permute.xlu0 %2552 }
0x1e67   :  { %v2549_v17 = vpop.permute.xlu1 %2548 }
0x1e68   :  { %v2555_v40 = vsel %vm308_vm4, %v2549_v17, %v2553_v16 }
0x1e69   :  { %v2557_v20 = vrot.slane %v2555_v40, 4 }
0x1e6b   :  { %4470 = vmatmul.mubr.msk.f32.vlgmr.msra.gmra.mrb[26].mxu0 %vm418_vm5, %v2557_v20 }
0x1e6c   :  { %4851 = vmatpush3.bf16.msra.mxu0 %v5713_v46  ;;  %4521 = vmatprep.mubr.msk.f32.mxu0 %vm5155_vm1, %v5154_v3 }
0x1e6d   :  { %4852 = vmatprep.subr.bf16.mxu0 %v5156_v10 }
0x1e70   :  { %4854 = vmatpush3.bf16.msra.mxu0 %v5719_v7 }
0x1e71   :  { %4855 = vmatprep.subr.bf16.mxu0 %v5156_v10 }
0x1e74   :  { %4857 = vmatpush3.bf16.msra.mxu0 %v5729_v50 }
0x1e75   :  { %4858 = vmatprep.subr.bf16.mxu0 %v5156_v10 }
0x1e78   :  { %4860 = vmatpush3.bf16.msra.mxu0 %v5741_v57 }
0x1e79   :  { %4867 = vmatprep.subr.bf16.mxu0 %v5156_v10 }
0x1f3e   :  { %v2626_v22 = vpop.f32.mrb[26].mxu0 }
0x1f3f   :  { %v2627_v23 = vadd.f32 %v5762_v5, %v2626_v22  ;;  %v4471_v24 = vpop.f32.mrb[27].mxu0 }
0x1f41   :  { %5097 = vtanh.f32 %v2627_v23  ;;  %v3864_v26 = vmul.f32 -1.442695, %v2627_v23 }
0x1f43   :  { %5099 = vpow2.f32 %v3864_v26 }
0x1f4b   :  { %v5098_v25 = vpop.eup %5097 }
0x1f4c   :  { %2639 = vrot.lane.b32.xlu1 %v5098_v25, %s5157_s30 }
0x1f4d   :  { %v5100_v41 = vpop.eup %5099 }
0x1f4e   :  { %v2633_v28 = vadd.f32 1.0, %v5100_v41 }
0x1f50   :  { %5101 = vrcp.f32 %v2633_v28 }
0x1f5a   :  { %v5102_v29 = vpop.eup %5101 }
0x1f5b   :  { %v2637_v32 = vmul.f32 %v5102_v29, %v5770_v27 }
0x1fbe   :  { %v2640_v30 = vpop.permute.xlu1 %2639 }
0x1fbf   :  { %v2642_v60 = vmul.f32 %v5102_v29, %v2640_v30 }
0x1fc1   :  { %2644 = vrot.lane.b32.xlu0 %v2642_v60, %s5158_s4 }
0x2033   :  { %v2645_v33 = vpop.permute.xlu0 %2644 }
0x2034   :  { %v5880_v43 = vadd.f32 %v2645_v33, %v2637_v32 }
0x2036   :  { %5103 = vtanh.f32 %v5880_v43 }
0x2040   :  { %v5104_v35 = vpop.eup %5103 }
0x2041   :  { %2650 = vrot.lane.b32.xlu1 %v5104_v35, %s5157_s30 }
0x2045   :  { %2803 = vrot.lane.b32.xlu1 %v2802_v51, %s5158_s4 }
0x20b3   :  { %v2651_v34 = vpop.permute.xlu1 %2650 }
0x20b4   :  { %v2653_v36 = vmul.f32 %v5102_v29, %v2651_v34 }
0x20b6   :  { %2655 = vrot.lane.b32.xlu0 %v2653_v36, %s5158_s4 }
0x20b7   :  { %v2804_v27 = vpop.permute.xlu1 %2803 }
0x2128   :  { %v2656_v39 = vpop.permute.xlu0 %2655 }
0x2129   :  { %4481 = vmatmul.mubr.msk.f32.vlgmr.msra.gmra.mrb[26].mxu1 %vm308_vm4, %v2656_v39 }
0x212a   :  { %4839 = vmatpush3.bf16.msra.mxu1 %v5808_v47  ;;  %4491 = vmatprep.mubr.msk.f32.mxu1 %vm5155_vm1, %v5154_v3 }
0x212b   :  { %4840 = vmatprep.subr.bf16.mxu1 %v5156_v10 }
0x212e   :  { %4842 = vmatpush3.bf16.msra.mxu1 %v5818_v37 }
0x212f   :  { %4843 = vmatprep.subr.bf16.mxu1 %v5156_v10 }
0x2131   :  { %4492 = vmatmul.mubr.msk.f32.vlgmr.msra.gmra.mrb[28].mxu1 %vm308_vm4, %v2656_v39 }
0x2132   :  { %4845 = vmatpush3.bf16.msra.mxu1 %v5652_v59  ;;  %4502 = vmatprep.mubr.msk.f32.mxu1 %vm5155_vm1, %v5154_v3 }
0x2133   :  { %4846 = vmatprep.subr.bf16.mxu1 %v5156_v10 }
0x2136   :  { %4848 = vmatpush3.bf16.msra.mxu1 %v5667_v1 }
0x2137   :  { %4861 = vmatprep.subr.bf16.mxu1 %v5156_v10 }
0x2139   :  { %4503 = vmatmul.mubr.msk.f32.vlgmr.msra.gmra.mrb[28].mxu1 %vm308_vm4, %v2804_v27 }
0x213a   :  { %4863 = vmatpush3.bf16.msra.mxu1 %v5782_v54  ;;  %4532 = vmatprep.mubr.msk.f32.mxu1 %vm5155_vm1, %v5154_v3 }
0x213b   :  { %4864 = vmatprep.subr.bf16.mxu1 %v5156_v10 }
0x213e   :  { %4866 = vmatpush3.bf16.msra.mxu1 %v5788_v31 }
0x213f   :  { %4873 = vmatprep.subr.bf16.mxu1 %v5156_v10 }
0x21fc   :  { %v2725_v18 = vpop.f32.mrb[26].mxu1 }
0x21fd   :  { %v2726_v42 = vadd.f32 %v5839_v38, %v2725_v18  ;;  %v4482_v45 = vpop.f32.mrb[27].mxu1 }
0x21ff   :  { %3866 = vst.msk [vmem:[%s6069_s17 + $0x4] sm:$0xf] %vm2362_vm8, %v2726_v42 }
0x220c   :  { %v2873_v15 = vpop.f32.mrb[28].mxu1 }
0x220d   :  { %v4931_v52 = vadd.f32 %v4930_v49, %v2873_v15  ;;  %v4504_v12 = vpop.f32.mrb[29].mxu1 }
0x220f   :  { %5105 = vtanh.f32 %v4931_v52  ;;  %v3869_v55 = vmul.f32 -1.442695, %v4931_v52 }
0x2211   :  { %5107 = vpow2.f32 %v3869_v55 }
0x2219   :  { %v5106_v53 = vpop.eup %5105 }
0x221a   :  { %2890 = vrot.lane.b32.xlu0 %v5106_v53, %s5157_s30 }
0x221b   :  { %v5108_v58 = vpop.eup %5107 }
0x221c   :  { %v2881_v61 = vadd.f32 1.0, %v5108_v58 }
0x221e   :  { %5109 = vrcp.f32 %v2881_v61 }
0x2228   :  { %v5110_v62 = vpop.eup %5109 }
0x2229   :  { %v2888_v2 = vmul.f32 %v5110_v62, %v2886_v56 }
0x228c   :  { %v2891_v63 = vpop.permute.xlu0 %2890 }
0x228d   :  { %v2893_v0 = vmul.f32 %v5110_v62, %v2891_v63 }
0x228f   :  { %2895 = vrot.lane.b32.xlu1 %v2893_v0, %s5158_s4 }
0x2301   :  { %v2896_v4 = vpop.permute.xlu1 %2895 }
0x2302   :  { %v5921_v6 = vadd.f32 %v2896_v4, %v2888_v2 }
0x2304   :  { %5111 = vtanh.f32 %v5921_v6  ;;  %v3245_v0 = vrot.slane %v5921_v6, 4 }
0x230e   :  { %v5112_v8 = vpop.eup %5111 }
0x230f   :  { %2901 = vrot.lane.b32.xlu0 %v5112_v8, %s5157_s30 }
0x2313   :  { %2909 = vrot.lane.b32.xlu0 %v2653_v36, %s5157_s30 }
0x2381   :  { %v2902_v9 = vpop.permute.xlu0 %2901 }
0x2382   :  { %v2904_v11 = vmul.f32 %v5110_v62, %v2902_v9 }
0x2384   :  { %2906 = vrot.lane.b32.xlu1 %v2904_v11, %s5158_s4 }
0x2385   :  { %v2910_v13 = vpop.permute.xlu0 %2909 }
0x23f6   :  { %v2907_v14 = vpop.permute.xlu1 %2906 }
0x23f7   :  { %v2912_v16 = vsel %vm308_vm4, %v2907_v14, %v2910_v13 }
0x23f8   :  { %4522 = vmatmul.mubr.msk.f32.vlgmr.msra.gmra.mrb[28].mxu0 %vm418_vm5, %v2912_v16 }
0x23f9   :  { %4869 = vmatpush3.bf16.msra.mxu0 %v5808_v47  ;;  %4543 = vmatprep.mubr.msk.f32.mxu0 %vm5155_vm1, %v5154_v3 }
0x23fa   :  { %4870 = vmatprep.subr.bf16.mxu0 %v5156_v10 }
0x23fd   :  { %4872 = vmatpush3.bf16.msra.mxu0 %v5818_v37 }
0x23fe   :  { %4879 = vmatprep.subr.bf16.mxu0 %v5156_v10 }
0x24cb   :  { %v2982_v21 = vpop.f32.mrb[28].mxu0 }
0x24cc   :  { %v2983_v17 = vadd.f32 %v5762_v5, %v2982_v21  ;;  %v4523_v40 = vpop.f32.mrb[29].mxu0 }
0x24ce   :  { %5113 = vtanh.f32 %v2983_v17  ;;  %v3871_v22 = vmul.f32 -1.442695, %v2983_v17 }
0x24d0   :  { %5115 = vpow2.f32 %v3871_v22 }
0x24d8   :  { %v5114_v20 = vpop.eup %5113 }
0x24d9   :  { %2995 = vrot.lane.b32.xlu1 %v5114_v20, %s5157_s30 }
0x24da   :  { %v5116_v23 = vpop.eup %5115 }
0x24db   :  { %v2989_v24 = vadd.f32 1.0, %v5116_v23 }
0x24dd   :  { %5117 = vrcp.f32 %v2989_v24 }
0x24e7   :  { %v5118_v25 = vpop.eup %5117 }
0x24e8   :  { %v2993_v28 = vmul.f32 %v5118_v25, %v5880_v43 }
0x254b   :  { %v2996_v26 = vpop.permute.xlu1 %2995 }
0x254c   :  { %v2998_v41 = vmul.f32 %v5118_v25, %v2996_v26 }
0x254e   :  { %3000 = vrot.lane.b32.xlu0 %v2998_v41, %s5158_s4 }
0x25c0   :  { %v3001_v29 = vpop.permute.xlu0 %3000 }
0x25c1   :  { %v5939_v30 = vadd.f32 %v3001_v29, %v2993_v28 }
0x25c3   :  { %5119 = vtanh.f32 %v5939_v30 }
0x25cd   :  { %v5120_v60 = vpop.eup %5119 }
0x25ce   :  { %3006 = vrot.lane.b32.xlu1 %v5120_v60, %s5157_s30 }
0x2640   :  { %v3007_v32 = vpop.permute.xlu1 %3006 }
0x2641   :  { %v3009_v33 = vmul.f32 %v5118_v25, %v3007_v32 }
0x2643   :  { %3011 = vrot.lane.b32.xlu0 %v3009_v33, %s5158_s4  ;;  %v3268_v8 = vrot.slane %v3009_v33, 4 }
0x26b5   :  { %v3012_v35 = vpop.permute.xlu0 %3011 }
0x26b6   :  { %4533 = vmatmul.mubr.msk.f32.vlgmr.msra.gmra.mrb[30].mxu1 %vm308_vm4, %v3012_v35  ;;  %4544 = vmatmul.mubr.msk.f32.vlgmr.msra.gmra.mrb[30].mxu0 %vm308_vm4, %v3012_v35 }
0x26b7   :  { %4875 = vmatpush3.bf16.msra.mxu1 %v5652_v59  ;;  %4554 = vmatprep.mubr.msk.f32.mxu1 %vm5155_vm1, %v5154_v3 }
0x26b8   :  { %4876 = vmatprep.subr.bf16.mxu1 %v5156_v10  ;;  %4881 = vmatpush3.bf16.msra.mxu0 %v5713_v46 }
0x26b9   :  { %4882 = vmatprep.subr.bf16.mxu0 %v5156_v10  ;;  %4573 = vmatprep.mubr.msk.f32.mxu0 %vm5155_vm1, %v5154_v3 }
0x26bb   :  { %4878 = vmatpush3.bf16.msra.mxu1 %v5667_v1 }
0x26bc   :  { %4884 = vmatpush3.bf16.msra.mxu0 %v5719_v7  ;;  %4891 = vmatprep.subr.bf16.mxu1 %v5156_v10 }
0x26bd   :  { %4885 = vmatprep.subr.bf16.mxu0 %v5156_v10 }
0x26be   :  { %4555 = vmatmul.mubr.msk.f32.vlgmr.msra.gmra.mrb[32].mxu1 %vm308_vm4, %v2907_v14 }
0x26bf   :  { %4893 = vmatpush3.bf16.msra.mxu1 %v5782_v54  ;;  %4584 = vmatprep.mubr.msk.f32.mxu1 %vm5155_vm1, %v5154_v3 }
0x26c0   :  { %4887 = vmatpush3.bf16.msra.mxu0 %v5729_v50  ;;  %4894 = vmatprep.subr.bf16.mxu1 %v5156_v10 }
0x26c1   :  { %4888 = vmatprep.subr.bf16.mxu0 %v5156_v10 }
0x26c3   :  { %4896 = vmatpush3.bf16.msra.mxu1 %v5788_v31 }
0x26c4   :  { %4890 = vmatpush3.bf16.msra.mxu0 %v5741_v57  ;;  %4897 = vmatprep.subr.bf16.mxu1 %v5156_v10 }
0x26c5   :  { %4909 = vmatprep.subr.bf16.mxu0 %v5156_v10 }
0x2789   :  { %v3081_v43 = vpop.f32.mrb[30].mxu1  ;;  %v3153_v51 = vpop.f32.mrb[30].mxu0 }
0x278a   :  { %v3082_v34 = vadd.f32 %v5839_v38, %v3081_v43  ;;  %v3154_v36 = vadd.f32 %v5849_v44, %v3153_v51  ;;  %v4534_v39 = vpop.f32.mrb[31].mxu1  ;;  %v4545_v27 = vpop.f32.mrb[31].mxu0 }
0x278c   :  { %3873 = vst.msk [vmem:[%s6069_s17 + $0x8] sm:$0xf] %vm2362_vm8, %v3082_v34  ;;  %v3158_v18 = vrot.slane %v3154_v36, 4 }
0x278e   :  { %v3160_v45 = vadd.f32 %v3158_v18, %v5914_v48 }
0x2791   :  { %v3229_v42 = vpop.f32.mrb[32].mxu1 }
0x2792   :  { %v3234_v49 = vrot.slane %v3229_v42, 4  ;;  %v4556_v15 = vpop.f32.mrb[33].mxu1 }
0x2794   :  { %v3236_v52 = vadd.f32 %v3234_v49, %v3160_v45 }
0x2796   :  { %5121 = vtanh.f32 %v3236_v52  ;;  %v3876_v53 = vmul.f32 -1.442695, %v3236_v52 }
0x2798   :  { %5123 = vpow2.f32 %v3876_v53 }
0x27a0   :  { %v5122_v12 = vpop.eup %5121 }
0x27a1   :  { %3249 = vrot.lane.b32.xlu1 %v5122_v12, %s5157_s30 }
0x27a2   :  { %v5124_v55 = vpop.eup %5123 }
0x27a3   :  { %v3240_v58 = vadd.f32 1.0, %v5124_v55 }
0x27a5   :  { %5125 = vrcp.f32 %v3240_v58 }
0x27af   :  { %v5126_v61 = vpop.eup %5125 }
0x27b0   :  { %v3247_v48 = vmul.f32 %v5126_v61, %v3245_v0 }
0x2813   :  { %v3250_v62 = vpop.permute.xlu1 %3249 }
0x2814   :  { %v3252_v63 = vmul.f32 %v5126_v61, %v3250_v62 }
0x2816   :  { %3254 = vrot.lane.b32.xlu0 %v3252_v63, %s5158_s4 }
0x2888   :  { %v3255_v56 = vpop.permute.xlu0 %3254 }
0x2889   :  { %v5979_v2 = vadd.f32 %v3255_v56, %v3247_v48 }
0x288b   :  { %5127 = vtanh.f32 %v5979_v2  ;;  %v3603_v39 = vrot.slane %v5979_v2, 4 }
0x2895   :  { %v5128_v4 = vpop.eup %5127 }
0x2896   :  { %3260 = vrot.lane.b32.xlu1 %v5128_v4, %s5157_s30 }
0x289a   :  { %3269 = vrot.lane.b32.xlu1 %v3268_v8, %s5157_s30 }
0x2908   :  { %v3261_v9 = vpop.permute.xlu1 %3260 }
0x2909   :  { %v3263_v11 = vmul.f32 %v5126_v61, %v3261_v9 }
0x290b   :  { %3265 = vrot.lane.b32.xlu0 %v3263_v11, %s5158_s4  ;;  %v3519_v28 = vrot.slane %v3263_v11, 4 }
0x290c   :  { %v3270_v13 = vpop.permute.xlu1 %3269 }
0x297d   :  { %v3266_v14 = vpop.permute.xlu0 %3265 }
0x297e   :  { %v3272_v6 = vsel %vm308_vm4, %v3266_v14, %v3270_v13 }
0x297f   :  { %v3274_v16 = vrot.slane %v3272_v6, 4 }
0x2981   :  { %4574 = vmatmul.mubr.msk.f32.vlgmr.msra.gmra.mrb[32].mxu0 %vm418_vm5, %v3274_v16 }
0x2982   :  { %4911 = vmatpush3.bf16.msra.mxu0 %v5713_v46  ;;  %4625 = vmatprep.mubr.msk.f32.mxu0 %vm5155_vm1, %v5154_v3 }
0x2983   :  { %4912 = vmatprep.subr.bf16.mxu0 %v5156_v10 }
0x2986   :  { %4914 = vmatpush3.bf16.msra.mxu0 %v5719_v7 }
0x2987   :  { %4915 = vmatprep.subr.bf16.mxu0 %v5156_v10 }
0x298a   :  { %4917 = vmatpush3.bf16.msra.mxu0 %v5729_v50 }
0x298b   :  { %4918 = vmatprep.subr.bf16.mxu0 %v5156_v10 }
0x298e   :  { %4920 = vmatpush3.bf16.msra.mxu0 %v5741_v57 }
0x2a54   :  { %v3343_v21 = vpop.f32.mrb[32].mxu0 }
0x2a55   :  { %v3344_v17 = vadd.f32 %v5762_v5, %v3343_v21  ;;  %v4575_v40 = vpop.f32.mrb[33].mxu0 }
0x2a57   :  { %5129 = vtanh.f32 %v3344_v17  ;;  %v3878_v20 = vmul.f32 -1.442695, %v3344_v17 }
0x2a59   :  { %5131 = vpow2.f32 %v3878_v20 }
0x2a61   :  { %v5130_v46 = vpop.eup %5129 }
0x2a62   :  { %3356 = vrot.lane.b32.xlu0 %v5130_v46, %s5157_s30 }
0x2a63   :  { %v5132_v22 = vpop.eup %5131 }
0x2a64   :  { %v3350_v7 = vadd.f32 1.0, %v5132_v22 }
0x2a66   :  { %5133 = vrcp.f32 %v3350_v7 }
0x2a70   :  { %v5134_v23 = vpop.eup %5133 }
0x2a71   :  { %v3354_v57 = vmul.f32 %v5134_v23, %v5939_v30 }
0x2ad4   :  { %v3357_v24 = vpop.permute.xlu0 %3356 }
0x2ad5   :  { %v3359_v50 = vmul.f32 %v5134_v23, %v3357_v24 }
0x2ad7   :  { %3361 = vrot.lane.b32.xlu1 %v3359_v50, %s5158_s4 }
0x2b49   :  { %v3362_v25 = vpop.permute.xlu1 %3361 }
0x2b4a   :  { %v6000_v26 = vadd.f32 %v3362_v25, %v3354_v57 }
0x2b4c   :  { %5135 = vtanh.f32 %v6000_v26 }
0x2b56   :  { %v5136_v41 = vpop.eup %5135 }
0x2b57   :  { %3367 = vrot.lane.b32.xlu0 %v5136_v41, %s5157_s30 }
0x2b5b   :  { %3520 = vrot.lane.b32.xlu0 %v3519_v28, %s5158_s4 }
0x2bc9   :  { %v3368_v29 = vpop.permute.xlu0 %3367 }
0x2bca   :  { %v3370_v60 = vmul.f32 %v5134_v23, %v3368_v29 }
0x2bcc   :  { %3372 = vrot.lane.b32.xlu1 %v3370_v60, %s5158_s4 }
0x2c3e   :  { %v3373_v32 = vpop.permute.xlu1 %3372 }
0x2c3f   :  { %4585 = vmatmul.mubr.msk.f32.vlgmr.msra.gmra.mrb[34].mxu1 %vm308_vm4, %v3373_v32 }
0x2c40   :  { %4899 = vmatpush3.bf16.msra.mxu1 %v5808_v47  ;;  %4595 = vmatprep.mubr.msk.f32.mxu1 %vm5155_vm1, %v5154_v3  ;;  %v3521_v47 = vpop.permute.xlu0 %3520 }
0x2c41   :  { %4900 = vmatprep.subr.bf16.mxu1 %v5156_v10 }
0x2c44   :  { %4902 = vmatpush3.bf16.msra.mxu1 %v5818_v37 }
0x2c45   :  { %4903 = vmatprep.subr.bf16.mxu1 %v5156_v10 }
0x2c47   :  { %4596 = vmatmul.mubr.msk.f32.vlgmr.msra.gmra.mrb[4].mxu1 %vm308_vm4, %v3373_v32 }
0x2c48   :  { %4905 = vmatpush3.bf16.msra.mxu1 %v5652_v59  ;;  %4606 = vmatprep.mubr.msk.f32.mxu1 %vm5155_vm1, %v5154_v3 }
0x2c49   :  { %4906 = vmatprep.subr.bf16.mxu1 %v5156_v10 }
0x2c4c   :  { %4908 = vmatpush3.bf16.msra.mxu1 %v5667_v1  ;;  %v4927_v1 = vadd.f32 %v5849_v44, %v5684_v19 }
0x2c4d   :  { %4921 = vmatprep.subr.bf16.mxu1 %v5156_v10 }
0x2c4f   :  { %4607 = vmatmul.mubr.msk.f32.vlgmr.msra.gmra.mrb[4].mxu1 %vm308_vm4, %v3521_v47 }
0x2c50   :  { %4923 = vmatpush3.bf16.msra.mxu1 %v5782_v54  ;;  %4636 = vmatprep.mubr.msk.f32.mxu1 %vm5155_vm1, %v5154_v3 }
0x2c51   :  { %4924 = vmatprep.subr.bf16.mxu1 %v5156_v10 }
0x2c54   :  { %4926 = vmatpush3.bf16.msra.mxu1 %v5788_v31 }
0x2d12   :  { %v3442_v59 = vpop.f32.mrb[34].mxu1 }
0x2d13   :  { %v3443_v37 = vadd.f32 %v5839_v38, %v3442_v59  ;;  %v4586_v30 = vpop.f32.mrb[35].mxu1 }
0x2d15   :  { %3880 = vst.msk [vmem:[%s6069_s17 + $0xc] sm:$0xf] %vm2362_vm8, %v3443_v37 }
0x2d22   :  { %v3590_v54 = vpop.f32.mrb[4].mxu1 }
0x2d23   :  { %v4928_v33 = vadd.f32 %v4927_v1, %v3590_v54  ;;  %v4608_v35 = vpop.f32.mrb[5].mxu1 }
0x2d25   :  { %5137 = vtanh.f32 %v4928_v33  ;;  %v3883_v10 = vmul.f32 -1.442695, %v4928_v33 }
0x2d27   :  { %5139 = vpow2.f32 %v3883_v10 }
0x2d2f   :  { %v5138_v3 = vpop.eup %5137 }
0x2d30   :  { %3607 = vrot.lane.b32.xlu1 %v5138_v3, %s5157_s30 }
0x2d31   :  { %v5140_v31 = vpop.eup %5139 }
0x2d32   :  { %v3598_v43 = vadd.f32 1.0, %v5140_v31 }
0x2d34   :  { %5141 = vrcp.f32 %v3598_v43 }
0x2d3e   :  { %v5142_v51 = vpop.eup %5141 }
0x2d3f   :  { %v3605_v19 = vmul.f32 %v5142_v51, %v3603_v39 }
0x2da2   :  { %v3608_v34 = vpop.permute.xlu1 %3607 }
0x2da3   :  { %v3610_v36 = vmul.f32 %v5142_v51, %v3608_v34 }
0x2da5   :  { %3612 = vrot.lane.b32.xlu0 %v3610_v36, %s5158_s4 }
0x2e17   :  { %v3613_v44 = vpop.permute.xlu0 %3612 }
0x2e18   :  { %v3615_v27 = vadd.f32 %v3613_v44, %v3605_v19 }
0x2e1a   :  { %5143 = vtanh.f32 %v3615_v27 }
0x2e24   :  { %v5144_v18 = vpop.eup %5143 }
0x2e25   :  { %3618 = vrot.lane.b32.xlu1 %v5144_v18, %s5157_s30 }
0x2e29   :  { %3626 = vrot.lane.b32.xlu1 %v3370_v60, %s5157_s30 }
0x2e97   :  { %v3619_v42 = vpop.permute.xlu1 %3618 }
0x2e98   :  { %v3621_v45 = vmul.f32 %v5142_v51, %v3619_v42 }
0x2e9a   :  { %3623 = vrot.lane.b32.xlu0 %v3621_v45, %s5158_s4 }
0x2e9b   :  { %v3627_v49 = vpop.permute.xlu1 %3626 }
0x2f0c   :  { %v3624_v15 = vpop.permute.xlu0 %3623 }
0x2f0d   :  { %v3629_v52 = vsel %vm308_vm4, %v3624_v15, %v3627_v49 }
0x2f0e   :  { %4626 = vmatmul.mubr.msk.f32.vlgmr.msra.gmra.mrb[34].mxu0 %vm418_vm5, %v3629_v52 }
0x2fe1   :  { %v3699_v12 = vpop.f32.mrb[34].mxu0 }
0x2fe2   :  { %v3700_v53 = vadd.f32 %v5762_v5, %v3699_v12  ;;  %v4627_v55 = vpop.f32.mrb[35].mxu0 }
0x2fe4   :  { %5145 = vtanh.f32 %v3700_v53  ;;  %v3885_v61 = vmul.f32 -1.442695, %v3700_v53 }
0x2fe6   :  { %5147 = vpow2.f32 %v3885_v61 }
0x2fee   :  { %v5146_v58 = vpop.eup %5145 }
0x2fef   :  { %3712 = vrot.lane.b32.xlu0 %v5146_v58, %s5157_s30 }
0x2ff0   :  { %v5148_v62 = vpop.eup %5147 }
0x2ff1   :  { %v3706_v63 = vadd.f32 1.0, %v5148_v62 }
0x2ff3   :  { %5149 = vrcp.f32 %v3706_v63 }
0x2ffd   :  { %v5150_v0 = vpop.eup %5149 }
0x2ffe   :  { %v3710_v2 = vmul.f32 %v5150_v0, %v6000_v26 }
0x3061   :  { %v3713_v48 = vpop.permute.xlu0 %3712 }
0x3062   :  { %v3715_v56 = vmul.f32 %v5150_v0, %v3713_v48 }
0x3064   :  { %3717 = vrot.lane.b32.xlu1 %v3715_v56, %s5158_s4 }
0x30d6   :  { %v3718_v4 = vpop.permute.xlu1 %3717 }
0x30d7   :  { %v3720_v8 = vadd.f32 %v3718_v4, %v3710_v2 }
0x30d9   :  { %5151 = vtanh.f32 %v3720_v8 }
0x30e3   :  { %v5152_v5 = vpop.eup %5151 }
0x30e4   :  { %3723 = vrot.lane.b32.xlu0 %v5152_v5, %s5157_s30 }
0x3156   :  { %v3724_v9 = vpop.permute.xlu0 %3723 }
0x3157   :  { %v3726_v11 = vmul.f32 %v5150_v0, %v3724_v9 }
0x3159   :  { %3728 = vrot.lane.b32.xlu1 %v3726_v11, %s5158_s4 }
0x31cb   :  { %v3729_v13 = vpop.permute.xlu1 %3728 }
0x31cc   :  { %4637 = vmatmul.mubr.msk.f32.vlgmr.msra.gmra.mrb[36].mxu1 %vm308_vm4, %v3729_v13 }
0x329f   :  { %v3798_v14 = vpop.f32.mrb[36].mxu1 }
0x32a0   :  { %v3799_v6 = vadd.f32 %v5839_v38, %v3798_v14  ;;  %v4638_v16 = vpop.f32.mrb[37].mxu1 }
0x32a2   :  { %3887 = vst.msk [vmem:[%s6069_s17 + $0x10] sm:$0xf] %vm2362_vm8, %v3799_v6 }

</bundles_post_ra>
